<compile_context>
chip_gen: v5e
topology: v5e:2x2
jax: 0.10.0
libtpu: 0.0.40
codegen_flags: <defaults>
</compile_context>

<pallas_src>
import functools
import math

import jax
import jax.numpy as jnp
from jax.experimental import pallas as pl
from jax.experimental.pallas import tpu as pltpu

EPS = 1e-6


# ----------------------------- shared math -----------------------------------
def _layer_norm(x, a2, b2):
    # a_2 * (x - mean) / (std + eps) + b_2 ; std unbiased (ddof=1) like torch.std
    d = x.shape[-1]
    mean = jnp.mean(x, axis=-1, keepdims=True)
    var = jnp.sum((x - mean) ** 2, axis=-1, keepdims=True) / (d - 1)
    std = jnp.sqrt(var)
    return a2 * (x - mean) / (std + EPS) + b2


# ----------------------------- in-kernel attention ----------------------------
def _multi_head_attention(q, k, v, mask, num_heads):
    """q: (S, D) f32, k/v: (Skv, D) f32, mask: (S, Skv) int. Returns (S, D) f32."""
    d_model = q.shape[-1]
    dk = d_model // num_heads
    scale = 1.0 / math.sqrt(dk)

    def split_heads(t):
        # (L, D) -> (H, L, dk): lane slices stacked on a new leading (batch) axis.
        return jnp.concatenate(
            [t[None, :, h * dk:(h + 1) * dk] for h in range(num_heads)], axis=0)

    qh = split_heads(q).astype(jnp.bfloat16)
    kh = split_heads(k).astype(jnp.bfloat16)
    vh = split_heads(v).astype(jnp.bfloat16)

    # Single batched contraction over all heads (no per-head matmul loop, no .T).
    s = jnp.einsum('hqd,hkd->hqk', qh, kh,
                   preferred_element_type=jnp.float32) * scale
    s = jnp.where(mask == 0, jnp.float32(-1e9), s)          # broadcast over heads

    # softmax in f32; reciprocal on the EUP.
    m = jnp.max(s, axis=-1, keepdims=True)
    e = jnp.exp(s - m)
    p = e * pl.reciprocal(jnp.sum(e, axis=-1, keepdims=True), approx=True)

    ctx = jnp.einsum('hqk,hkd->hqd', p.astype(jnp.bfloat16), vh,
                     preferred_element_type=jnp.float32)     # (H, S, dk)
    return jnp.concatenate([ctx[h] for h in range(num_heads)], axis=-1)  # (S, D)


# ----------------------------- fused decoder-layer kernel ---------------------
def _decoder_layer_kernel(
        x_ref, mem_ref, tmask_ref, smask_ref,
        # self-attention sublayer params
        sa_a_ref, sa_b_ref, sa_wqkv_ref, sa_bqkv_ref, sa_wo_ref, sa_bo_ref,
        # source-attention sublayer params
        ca_a_ref, ca_b_ref, ca_wq_ref, ca_bq_ref, ca_wkv_ref, ca_bkv_ref,
        ca_wo_ref, ca_bo_ref,
        # feed-forward sublayer params
        ff_a_ref, ff_b_ref, ff_w1_ref, ff_b1_ref, ff_w2_ref, ff_b2_ref,
        o_ref, *, num_heads):
    f32, bf16 = jnp.float32, jnp.bfloat16

    x = x_ref[...].astype(f32)           # (S, D) residual stream, stays resident
    mem = mem_ref[...].astype(bf16)      # (Skv, D) encoder memory (K/V source)
    d_model = x.shape[-1]

    # ---- sublayer 0: pre-LN -> self-attention (Q = K = V) -> residual ----
    xn = _layer_norm(x, sa_a_ref[...], sa_b_ref[...]).astype(bf16)
    qkv = jnp.dot(xn, sa_wqkv_ref[...],
                  preferred_element_type=f32) + sa_bqkv_ref[...]
    q = qkv[:, :d_model]
    k = qkv[:, d_model:2 * d_model]
    v = qkv[:, 2 * d_model:]
    attn = _multi_head_attention(q, k, v, tmask_ref[...], num_heads)
    x = x + jnp.dot(attn.astype(bf16), sa_wo_ref[...],
                    preferred_element_type=f32) + sa_bo_ref[...]

    # ---- sublayer 1: pre-LN -> src-attention (Q from x, K = V from memory) ----
    xn = _layer_norm(x, ca_a_ref[...], ca_b_ref[...]).astype(bf16)
    q = jnp.dot(xn, ca_wq_ref[...], preferred_element_type=f32) + ca_bq_ref[...]
    kv = jnp.dot(mem, ca_wkv_ref[...],
                 preferred_element_type=f32) + ca_bkv_ref[...]
    k = kv[:, :d_model]
    v = kv[:, d_model:]
    attn = _multi_head_attention(q, k, v, smask_ref[...], num_heads)
    x = x + jnp.dot(attn.astype(bf16), ca_wo_ref[...],
                    preferred_element_type=f32) + ca_bo_ref[...]

    # ---- sublayer 2: pre-LN -> position-wise FFN -> residual ----
    xn = _layer_norm(x, ff_a_ref[...], ff_b_ref[...]).astype(bf16)
    h = jnp.dot(xn, ff_w1_ref[...], preferred_element_type=f32) + ff_b1_ref[...]
    h = jnp.maximum(h, 0.0).astype(bf16)                     # ReLU
    y = jnp.dot(h, ff_w2_ref[...], preferred_element_type=f32) + ff_b2_ref[...]

    o_ref[...] = (x + y).astype(o_ref.dtype)


# ----------------------------- wrapper -----------------------------------------
def decoder_layer(x, memory, source_mask, target_mask, params, *, num_heads):
    B, S, D = x.shape
    flat_params = tuple(params["self_attn"]) + tuple(params["src_attn"]) \
        + tuple(params["ffn"])

    def batch_spec(shape):
        # one batch element per grid step; leading batch dim squeezed away
        nrest = len(shape) - 1
        return pl.BlockSpec((None,) + tuple(shape[1:]),
                            lambda b, _n=nrest: (b,) + (0,) * _n)

    def rep_spec(shape):
        nd = len(shape)
        return pl.BlockSpec(tuple(shape), lambda b, _n=nd: (0,) * _n)

    in_specs = [batch_spec(x.shape), batch_spec(memory.shape),
                batch_spec(target_mask.shape), batch_spec(source_mask.shape)]
    in_specs += [rep_spec(p.shape) for p in flat_params]

    kernel = functools.partial(_decoder_layer_kernel, num_heads=num_heads)
    return pl.pallas_call(
        kernel,
        out_shape=jax.ShapeDtypeStruct((B, S, D), x.dtype),
        grid=(B,),
        in_specs=in_specs,
        out_specs=batch_spec((B, S, D)),
        compiler_params=pltpu.CompilerParams(
            dimension_semantics=("parallel",)),   # batch axis -> both TCs on v7x
    )(x, memory, target_mask, source_mask, *flat_params)


# ----------------------------- parameter init ----------------------------------
def init_params(key, d_model, d_ff, w_dtype=jnp.bfloat16):
    ks = jax.random.split(key, 10)

    def lin(k, din, dout):
        bound = 1.0 / math.sqrt(din)
        kw, kb = jax.random.split(k)
        w = jax.random.uniform(kw, (din, dout), jnp.float32, -bound, bound)
        b = jax.random.uniform(kb, (1, dout), jnp.float32, -bound, bound)
        return w.astype(w_dtype), b      # weights bf16 (half DMA), biases f32

    def ln():
        return (jnp.ones((1, d_model), jnp.float32),
                jnp.zeros((1, d_model), jnp.float32))

    # self-attention: fused [Wq|Wk|Wv] + output projection
    wq, bq = lin(ks[0], d_model, d_model)
    wk, bk = lin(ks[1], d_model, d_model)
    wv, bv = lin(ks[2], d_model, d_model)
    wo, bo = lin(ks[3], d_model, d_model)
    a2, b2 = ln()
    self_attn = (a2, b2,
                 jnp.concatenate([wq, wk, wv], axis=1),
                 jnp.concatenate([bq, bk, bv], axis=1),
                 wo, bo)

    # src-attention: Wq applies to x, fused [Wk|Wv] applies to memory
    wq, bq = lin(ks[4], d_model, d_model)
    wk, bk = lin(ks[5], d_model, d_model)
    wv, bv = lin(ks[6], d_model, d_model)
    wo, bo = lin(ks[7], d_model, d_model)
    a2, b2 = ln()
    src_attn = (a2, b2, wq, bq,
                jnp.concatenate([wk, wv], axis=1),
                jnp.concatenate([bk, bv], axis=1),
                wo, bo)

    a2, b2 = ln()
    w1, b1 = lin(ks[8], d_model, d_ff)
    w2, b2w = lin(ks[9], d_ff, d_model)
    ffn = (a2, b2, w1, b1, w2, b2w)
    return {"self_attn": self_attn, "src_attn": src_attn, "ffn": ffn}


# ----------------------------- pure-JAX reference ------------------------------
def _ref_attention(q, k, v, mask, num_heads):
    B, S, D = q.shape
    Skv = k.shape[1]
    dk = D // num_heads
    qh = q.reshape(B, S, num_heads, dk).transpose(0, 2, 1, 3)
    kh = k.reshape(B, Skv, num_heads, dk).transpose(0, 2, 1, 3)
    vh = v.reshape(B, Skv, num_heads, dk).transpose(0, 2, 1, 3)
    s = jnp.einsum('bhqd,bhkd->bhqk', qh, kh) / math.sqrt(dk)
    s = jnp.where(mask[:, None, :, :] == 0, -1e9, s)
    p = jax.nn.softmax(s, axis=-1)
    o = jnp.einsum('bhqk,bhkd->bhqd', p, vh)
    return o.transpose(0, 2, 1, 3).reshape(B, S, D)


def decoder_layer_ref(x, memory, source_mask, target_mask, params, *, num_heads):
    f32 = jnp.float32
    d = x.shape[-1]

    a2, b2, wqkv, bqkv, wo, bo = params["self_attn"]
    xn = _layer_norm(x, a2, b2)
    qkv = xn @ wqkv.astype(f32) + bqkv
    q, k, v = qkv[..., :d], qkv[..., d:2 * d], qkv[..., 2 * d:]
    x = x + _ref_attention(q, k, v, target_mask, num_heads) @ wo.astype(f32) + bo

    a2, b2, wq, bq, wkv, bkv, wo, bo = params["src_attn"]
    xn = _layer_norm(x, a2, b2)
    q = xn @ wq.astype(f32) + bq
    kv = memory @ wkv.astype(f32) + bkv
    k, v = kv[..., :d], kv[..., d:]
    x = x + _ref_attention(q, k, v, source_mask, num_heads) @ wo.astype(f32) + bo

    a2, b2, w1, b1, w2, b2w = params["ffn"]
    xn = _layer_norm(x, a2, b2)
    h = jnp.maximum(xn @ w1.astype(f32) + b1, 0.0)
    return x + h @ w2.astype(f32) + b2w


# ----------------------------- main ---------------------------------------------
if __name__ == "__main__":
    B, S, D, H, F = 2, 8, 32, 4, 64   # batch, seq, d_model, heads, d_ff

    key = jax.random.PRNGKey(0)
    kx, km, kp = jax.random.split(key, 3)
    x = jax.random.normal(kx, (B, S, D), jnp.float32)
    memory = jax.random.normal(km, (B, S, D), jnp.float32)

    # target mask: causal (subsequent) mask; source mask: pad last 2 memory slots of batch 1
    target_mask = jnp.broadcast_to(
        jnp.tril(jnp.ones((S, S), jnp.int32)), (B, S, S)).astype(jnp.int32)
    source_mask = jnp.ones((B, S, S), jnp.int32).at[1, :, S - 2:].set(0)

    params = init_params(kp, D, F)

    fwd = jax.jit(functools.partial(decoder_layer, num_heads=H))
    out = jax.block_until_ready(fwd(x, memory, source_mask, target_mask, params))

    ref = decoder_layer_ref(x, memory, source_mask, target_mask, params, num_heads=H)
    assert out.shape == (B, S, D) and out.dtype == jnp.float32
    max_err = float(jnp.max(jnp.abs(out - ref)))
    # bf16 matmuls + approx reciprocal vs f32 reference -> loosened tolerance
    assert jnp.allclose(out, ref, atol=5e-2, rtol=2e-2), \
        f"mismatch vs pure-JAX reference (max abs err {max_err})"

    print("KERNEL_OK")
</pallas_src>

<mosaic_0001>
module attributes {stable_mosaic.version = 11 : i64} {
  func.func @_decoder_layer_kernel(%arg0: i32, %arg1: memref<1x8x32xf32, #tpu.memory_space<vmem>>, %arg2: memref<1x8x32xf32, #tpu.memory_space<vmem>>, %arg3: memref<1x8x8xi32, #tpu.memory_space<vmem>>, %arg4: memref<1x8x8xi32, #tpu.memory_space<vmem>>, %arg5: memref<1x32xf32, #tpu.memory_space<vmem>>, %arg6: memref<1x32xf32, #tpu.memory_space<vmem>>, %arg7: memref<32x96xbf16, #tpu.memory_space<vmem>>, %arg8: memref<1x96xf32, #tpu.memory_space<vmem>>, %arg9: memref<32x32xbf16, #tpu.memory_space<vmem>>, %arg10: memref<1x32xf32, #tpu.memory_space<vmem>>, %arg11: memref<1x32xf32, #tpu.memory_space<vmem>>, %arg12: memref<1x32xf32, #tpu.memory_space<vmem>>, %arg13: memref<32x32xbf16, #tpu.memory_space<vmem>>, %arg14: memref<1x32xf32, #tpu.memory_space<vmem>>, %arg15: memref<32x64xbf16, #tpu.memory_space<vmem>>, %arg16: memref<1x64xf32, #tpu.memory_space<vmem>>, %arg17: memref<32x32xbf16, #tpu.memory_space<vmem>>, %arg18: memref<1x32xf32, #tpu.memory_space<vmem>>, %arg19: memref<1x32xf32, #tpu.memory_space<vmem>>, %arg20: memref<1x32xf32, #tpu.memory_space<vmem>>, %arg21: memref<32x64xbf16, #tpu.memory_space<vmem>>, %arg22: memref<1x64xf32, #tpu.memory_space<vmem>>, %arg23: memref<64x32xbf16, #tpu.memory_space<vmem>>, %arg24: memref<1x32xf32, #tpu.memory_space<vmem>>, %arg25: memref<1x8x32xf32, #tpu.memory_space<vmem>>) attributes {dimension_semantics = [#tpu.dimension_semantics<parallel>], iteration_bounds = array<i64: 2>, scalar_prefetch = 0 : i64, scratch_operands = 0 : i64, tpu.core_type = #tpu.core_type<tc>, window_params = [{transform_indices = @transform_0, window_bounds = array<i64: 1, 8, 32>}, {transform_indices = @transform_1, window_bounds = array<i64: 1, 8, 32>}, {transform_indices = @transform_2, window_bounds = array<i64: 1, 8, 8>}, {transform_indices = @transform_3, window_bounds = array<i64: 1, 8, 8>}, {pipeline_mode = #tpu.pipeline_mode<synchronous>, transform_indices = @transform_4, window_bounds = array<i64: 1, 32>}, {pipeline_mode = #tpu.pipeline_mode<synchronous>, transform_indices = @transform_5, window_bounds = array<i64: 1, 32>}, {pipeline_mode = #tpu.pipeline_mode<synchronous>, transform_indices = @transform_6, window_bounds = array<i64: 32, 96>}, {pipeline_mode = #tpu.pipeline_mode<synchronous>, transform_indices = @transform_7, window_bounds = array<i64: 1, 96>}, {pipeline_mode = #tpu.pipeline_mode<synchronous>, transform_indices = @transform_8, window_bounds = array<i64: 32, 32>}, {pipeline_mode = #tpu.pipeline_mode<synchronous>, transform_indices = @transform_9, window_bounds = array<i64: 1, 32>}, {pipeline_mode = #tpu.pipeline_mode<synchronous>, transform_indices = @transform_10, window_bounds = array<i64: 1, 32>}, {pipeline_mode = #tpu.pipeline_mode<synchronous>, transform_indices = @transform_11, window_bounds = array<i64: 1, 32>}, {pipeline_mode = #tpu.pipeline_mode<synchronous>, transform_indices = @transform_12, window_bounds = array<i64: 32, 32>}, {pipeline_mode = #tpu.pipeline_mode<synchronous>, transform_indices = @transform_13, window_bounds = array<i64: 1, 32>}, {pipeline_mode = #tpu.pipeline_mode<synchronous>, transform_indices = @transform_14, window_bounds = array<i64: 32, 64>}, {pipeline_mode = #tpu.pipeline_mode<synchronous>, transform_indices = @transform_15, window_bounds = array<i64: 1, 64>}, {pipeline_mode = #tpu.pipeline_mode<synchronous>, transform_indices = @transform_16, window_bounds = array<i64: 32, 32>}, {pipeline_mode = #tpu.pipeline_mode<synchronous>, transform_indices = @transform_17, window_bounds = array<i64: 1, 32>}, {pipeline_mode = #tpu.pipeline_mode<synchronous>, transform_indices = @transform_18, window_bounds = array<i64: 1, 32>}, {pipeline_mode = #tpu.pipeline_mode<synchronous>, transform_indices = @transform_19, window_bounds = array<i64: 1, 32>}, {pipeline_mode = #tpu.pipeline_mode<synchronous>, transform_indices = @transform_20, window_bounds = array<i64: 32, 64>}, {pipeline_mode = #tpu.pipeline_mode<synchronous>, transform_indices = @transform_21, window_bounds = array<i64: 1, 64>}, {pipeline_mode = #tpu.pipeline_mode<synchronous>, transform_indices = @transform_22, window_bounds = array<i64: 64, 32>}, {pipeline_mode = #tpu.pipeline_mode<synchronous>, transform_indices = @transform_23, window_bounds = array<i64: 1, 32>}, {transform_indices = @transform_24, window_bounds = array<i64: 1, 8, 32>}]} {
    %c0 = arith.constant 0 : index
    %c0_0 = arith.constant 0 : index
    %c0_1 = arith.constant 0 : index
    %0 = vector.load %arg1[%c0, %c0_0, %c0_1] : memref<1x8x32xf32, #tpu.memory_space<vmem>>, vector<1x8x32xf32>
    %1 = vector.shape_cast %0 : vector<1x8x32xf32> to vector<8x32xf32>
    %c0_2 = arith.constant 0 : index
    %c0_3 = arith.constant 0 : index
    %c0_4 = arith.constant 0 : index
    %2 = vector.load %arg2[%c0_2, %c0_3, %c0_4] : memref<1x8x32xf32, #tpu.memory_space<vmem>>, vector<1x8x32xf32>
    %3 = vector.shape_cast %2 : vector<1x8x32xf32> to vector<8x32xf32>
    %4 = arith.truncf %3 : vector<8x32xf32> to vector<8x32xbf16>
    %c0_5 = arith.constant 0 : index
    %c0_6 = arith.constant 0 : index
    %5 = vector.load %arg5[%c0_5, %c0_6] : memref<1x32xf32, #tpu.memory_space<vmem>>, vector<1x32xf32>
    %c0_7 = arith.constant 0 : index
    %c0_8 = arith.constant 0 : index
    %6 = vector.load %arg6[%c0_7, %c0_8] : memref<1x32xf32, #tpu.memory_space<vmem>>, vector<1x32xf32>
    %cst = arith.constant dense<0.000000e+00> : vector<8xf32>
    %7 = vector.multi_reduction <add>, %1, %cst [1] : vector<8x32xf32> to vector<8xf32>
    %8 = vector.shape_cast %7 : vector<8xf32> to vector<8x1xf32>
    %cst_9 = arith.constant 3.200000e+01 : f32
    %9 = vector.broadcast %cst_9 : f32 to vector<8x1xf32>
    %10 = arith.divf %8, %9 : vector<8x1xf32>
    %11 = vector.broadcast %10 : vector<8x1xf32> to vector<8x32xf32>
    %12 = arith.subf %1, %11 : vector<8x32xf32>
    %13 = arith.mulf %12, %12 : vector<8x32xf32>
    %cst_10 = arith.constant dense<0.000000e+00> : vector<8xf32>
    %14 = vector.multi_reduction <add>, %13, %cst_10 [1] : vector<8x32xf32> to vector<8xf32>
    %15 = vector.shape_cast %14 : vector<8xf32> to vector<8x1xf32>
    %cst_11 = arith.constant 3.100000e+01 : f32
    %16 = vector.broadcast %cst_11 : f32 to vector<8x1xf32>
    %17 = arith.divf %15, %16 : vector<8x1xf32>
    %18 = math.sqrt %17 : vector<8x1xf32>
    %19 = vector.broadcast %10 : vector<8x1xf32> to vector<8x32xf32>
    %20 = arith.subf %1, %19 : vector<8x32xf32>
    %21 = vector.broadcast %5 : vector<1x32xf32> to vector<8x32xf32>
    %22 = arith.mulf %21, %20 : vector<8x32xf32>
    %cst_12 = arith.constant 9.99999997E-7 : f32
    %23 = vector.broadcast %cst_12 : f32 to vector<8x1xf32>
    %24 = arith.addf %18, %23 : vector<8x1xf32>
    %25 = vector.broadcast %24 : vector<8x1xf32> to vector<8x32xf32>
    %26 = arith.divf %22, %25 : vector<8x32xf32>
    %27 = vector.broadcast %6 : vector<1x32xf32> to vector<8x32xf32>
    %28 = arith.addf %26, %27 : vector<8x32xf32>
    %29 = arith.truncf %28 : vector<8x32xf32> to vector<8x32xbf16>
    %c0_13 = arith.constant 0 : index
    %c0_14 = arith.constant 0 : index
    %30 = vector.load %arg7[%c0_13, %c0_14] : memref<32x96xbf16, #tpu.memory_space<vmem>>, vector<32x96xbf16>
    %cst_15 = arith.constant dense<0.000000e+00> : vector<8x96xf32>
    %31 = tpu.matmul %29, %30, %cst_15 {dimension_numbers = #tpu.dot_dimension_numbers<[1], [0], [0], [1], [0, 0, 1, 1], [], []>} : vector<8x32xbf16>, vector<32x96xbf16>, vector<8x96xf32> -> vector<8x96xf32>
    %c0_16 = arith.constant 0 : index
    %c0_17 = arith.constant 0 : index
    %32 = vector.load %arg8[%c0_16, %c0_17] : memref<1x96xf32, #tpu.memory_space<vmem>>, vector<1x96xf32>
    %33 = vector.broadcast %32 : vector<1x96xf32> to vector<8x96xf32>
    %34 = arith.addf %31, %33 : vector<8x96xf32>
    %35 = vector.extract_strided_slice %34 {offsets = [0, 0], sizes = [8, 32], strides = [1, 1]} : vector<8x96xf32> to vector<8x32xf32>
    %36 = vector.extract_strided_slice %34 {offsets = [0, 32], sizes = [8, 32], strides = [1, 1]} : vector<8x96xf32> to vector<8x32xf32>
    %37 = vector.extract_strided_slice %34 {offsets = [0, 64], sizes = [8, 32], strides = [1, 1]} : vector<8x96xf32> to vector<8x32xf32>
    %c0_18 = arith.constant 0 : index
    %c0_19 = arith.constant 0 : index
    %c0_20 = arith.constant 0 : index
    %38 = vector.load %arg3[%c0_18, %c0_19, %c0_20] : memref<1x8x8xi32, #tpu.memory_space<vmem>>, vector<1x8x8xi32>
    %39 = vector.shape_cast %38 : vector<1x8x8xi32> to vector<8x8xi32>
    %40 = vector.extract_strided_slice %35 {offsets = [0, 0], sizes = [8, 8], strides = [1, 1]} : vector<8x32xf32> to vector<8x8xf32>
    %41 = vector.shape_cast %40 : vector<8x8xf32> to vector<1x8x8xf32>
    %42 = vector.extract_strided_slice %35 {offsets = [0, 8], sizes = [8, 8], strides = [1, 1]} : vector<8x32xf32> to vector<8x8xf32>
    %43 = vector.shape_cast %42 : vector<8x8xf32> to vector<1x8x8xf32>
    %44 = vector.extract_strided_slice %35 {offsets = [0, 16], sizes = [8, 8], strides = [1, 1]} : vector<8x32xf32> to vector<8x8xf32>
    %45 = vector.shape_cast %44 : vector<8x8xf32> to vector<1x8x8xf32>
    %46 = vector.extract_strided_slice %35 {offsets = [0, 24], sizes = [8, 8], strides = [1, 1]} : vector<8x32xf32> to vector<8x8xf32>
    %47 = vector.shape_cast %46 : vector<8x8xf32> to vector<1x8x8xf32>
    %48 = tpu.concatenate %41, %43, %45, %47 in 0 : vector<1x8x8xf32>, vector<1x8x8xf32>, vector<1x8x8xf32>, vector<1x8x8xf32> -> vector<4x8x8xf32>
    %49 = arith.truncf %48 : vector<4x8x8xf32> to vector<4x8x8xbf16>
    %50 = vector.extract_strided_slice %36 {offsets = [0, 0], sizes = [8, 8], strides = [1, 1]} : vector<8x32xf32> to vector<8x8xf32>
    %51 = vector.shape_cast %50 : vector<8x8xf32> to vector<1x8x8xf32>
    %52 = vector.extract_strided_slice %36 {offsets = [0, 8], sizes = [8, 8], strides = [1, 1]} : vector<8x32xf32> to vector<8x8xf32>
    %53 = vector.shape_cast %52 : vector<8x8xf32> to vector<1x8x8xf32>
    %54 = vector.extract_strided_slice %36 {offsets = [0, 16], sizes = [8, 8], strides = [1, 1]} : vector<8x32xf32> to vector<8x8xf32>
    %55 = vector.shape_cast %54 : vector<8x8xf32> to vector<1x8x8xf32>
    %56 = vector.extract_strided_slice %36 {offsets = [0, 24], sizes = [8, 8], strides = [1, 1]} : vector<8x32xf32> to vector<8x8xf32>
    %57 = vector.shape_cast %56 : vector<8x8xf32> to vector<1x8x8xf32>
    %58 = tpu.concatenate %51, %53, %55, %57 in 0 : vector<1x8x8xf32>, vector<1x8x8xf32>, vector<1x8x8xf32>, vector<1x8x8xf32> -> vector<4x8x8xf32>
    %59 = arith.truncf %58 : vector<4x8x8xf32> to vector<4x8x8xbf16>
    %60 = vector.extract_strided_slice %37 {offsets = [0, 0], sizes = [8, 8], strides = [1, 1]} : vector<8x32xf32> to vector<8x8xf32>
    %61 = vector.shape_cast %60 : vector<8x8xf32> to vector<1x8x8xf32>
    %62 = vector.extract_strided_slice %37 {offsets = [0, 8], sizes = [8, 8], strides = [1, 1]} : vector<8x32xf32> to vector<8x8xf32>
    %63 = vector.shape_cast %62 : vector<8x8xf32> to vector<1x8x8xf32>
    %64 = vector.extract_strided_slice %37 {offsets = [0, 16], sizes = [8, 8], strides = [1, 1]} : vector<8x32xf32> to vector<8x8xf32>
    %65 = vector.shape_cast %64 : vector<8x8xf32> to vector<1x8x8xf32>
    %66 = vector.extract_strided_slice %37 {offsets = [0, 24], sizes = [8, 8], strides = [1, 1]} : vector<8x32xf32> to vector<8x8xf32>
    %67 = vector.shape_cast %66 : vector<8x8xf32> to vector<1x8x8xf32>
    %68 = tpu.concatenate %61, %63, %65, %67 in 0 : vector<1x8x8xf32>, vector<1x8x8xf32>, vector<1x8x8xf32>, vector<1x8x8xf32> -> vector<4x8x8xf32>
    %69 = arith.truncf %68 : vector<4x8x8xf32> to vector<4x8x8xbf16>
    "tpu.trace_start"() <{level = 10 : i32, message = "hqd,hkd->hqk"}> : () -> ()
    %cst_21 = arith.constant dense<0.000000e+00> : vector<4x8x8xf32>
    %70 = tpu.matmul %49, %59, %cst_21 {dimension_numbers = #tpu.dot_dimension_numbers<[2], [2], [1], [1], [0, 0, 0, 1, 1, 1], [0], [0]>} : vector<4x8x8xbf16>, vector<4x8x8xbf16>, vector<4x8x8xf32> -> vector<4x8x8xf32>
    "tpu.trace_stop"() : () -> ()
    %cst_22 = arith.constant 0.353553385 : f32
    %71 = vector.broadcast %cst_22 : f32 to vector<4x8x8xf32>
    %72 = arith.mulf %70, %71 : vector<4x8x8xf32>
    %c0_i32 = arith.constant 0 : i32
    %73 = vector.broadcast %c0_i32 : i32 to vector<8x8xi32>
    %74 = arith.cmpi eq, %39, %73 : vector<8x8xi32>
    %cst_23 = arith.constant -1.000000e+09 : f32
    %75 = vector.shape_cast %74 : vector<8x8xi1> to vector<1x8x8xi1>
    %76 = vector.broadcast %75 : vector<1x8x8xi1> to vector<4x8x8xi1>
    %77 = vector.broadcast %cst_23 : f32 to vector<4x8x8xf32>
    %78 = arith.select %76, %77, %72 : vector<4x8x8xi1>, vector<4x8x8xf32>
    %cst_24 = arith.constant dense<0xFF800000> : vector<4x8xf32>
    %79 = vector.multi_reduction <maximumf>, %78, %cst_24 [2] : vector<4x8x8xf32> to vector<4x8xf32>
    %80 = vector.shape_cast %79 : vector<4x8xf32> to vector<4x8x1xf32>
    %81 = vector.broadcast %80 : vector<4x8x1xf32> to vector<4x8x8xf32>
    %82 = arith.subf %78, %81 : vector<4x8x8xf32>
    %83 = math.exp %82 : vector<4x8x8xf32>
    %cst_25 = arith.constant dense<0.000000e+00> : vector<4x8xf32>
    %84 = vector.multi_reduction <add>, %83, %cst_25 [2] : vector<4x8x8xf32> to vector<4x8xf32>
    %85 = vector.shape_cast %84 : vector<4x8xf32> to vector<4x8x1xf32>
    %86 = tpu.reciprocal %85 {approx = true} : vector<4x8x1xf32> -> vector<4x8x1xf32>
    %87 = vector.broadcast %86 : vector<4x8x1xf32> to vector<4x8x8xf32>
    %88 = arith.mulf %83, %87 : vector<4x8x8xf32>
    %89 = arith.truncf %88 : vector<4x8x8xf32> to vector<4x8x8xbf16>
    "tpu.trace_start"() <{level = 10 : i32, message = "hqk,hkd->hqd"}> : () -> ()
    %cst_26 = arith.constant dense<0.000000e+00> : vector<4x8x8xf32>
    %90 = tpu.matmul %89, %69, %cst_26 {dimension_numbers = #tpu.dot_dimension_numbers<[2], [1], [1], [2], [0, 0, 0, 1, 1, 2], [0], [0]>} : vector<4x8x8xbf16>, vector<4x8x8xbf16>, vector<4x8x8xf32> -> vector<4x8x8xf32>
    "tpu.trace_stop"() : () -> ()
    %91 = vector.extract_strided_slice %90 {offsets = [0, 0, 0], sizes = [1, 8, 8], strides = [1, 1, 1]} : vector<4x8x8xf32> to vector<1x8x8xf32>
    %92 = vector.shape_cast %91 : vector<1x8x8xf32> to vector<8x8xf32>
    %93 = vector.extract_strided_slice %90 {offsets = [1, 0, 0], sizes = [1, 8, 8], strides = [1, 1, 1]} : vector<4x8x8xf32> to vector<1x8x8xf32>
    %94 = vector.shape_cast %93 : vector<1x8x8xf32> to vector<8x8xf32>
    %95 = vector.extract_strided_slice %90 {offsets = [2, 0, 0], sizes = [1, 8, 8], strides = [1, 1, 1]} : vector<4x8x8xf32> to vector<1x8x8xf32>
    %96 = vector.shape_cast %95 : vector<1x8x8xf32> to vector<8x8xf32>
    %97 = vector.extract_strided_slice %90 {offsets = [3, 0, 0], sizes = [1, 8, 8], strides = [1, 1, 1]} : vector<4x8x8xf32> to vector<1x8x8xf32>
    %98 = vector.shape_cast %97 : vector<1x8x8xf32> to vector<8x8xf32>
    %99 = tpu.concatenate %92, %94, %96, %98 in 1 : vector<8x8xf32>, vector<8x8xf32>, vector<8x8xf32>, vector<8x8xf32> -> vector<8x32xf32>
    %100 = arith.truncf %99 : vector<8x32xf32> to vector<8x32xbf16>
    %c0_27 = arith.constant 0 : index
    %c0_28 = arith.constant 0 : index
    %101 = vector.load %arg9[%c0_27, %c0_28] : memref<32x32xbf16, #tpu.memory_space<vmem>>, vector<32x32xbf16>
    %cst_29 = arith.constant dense<0.000000e+00> : vector<8x32xf32>
    %102 = tpu.matmul %100, %101, %cst_29 {dimension_numbers = #tpu.dot_dimension_numbers<[1], [0], [0], [1], [0, 0, 1, 1], [], []>} : vector<8x32xbf16>, vector<32x32xbf16>, vector<8x32xf32> -> vector<8x32xf32>
    %103 = arith.addf %1, %102 : vector<8x32xf32>
    %c0_30 = arith.constant 0 : index
    %c0_31 = arith.constant 0 : index
    %104 = vector.load %arg10[%c0_30, %c0_31] : memref<1x32xf32, #tpu.memory_space<vmem>>, vector<1x32xf32>
    %105 = vector.broadcast %104 : vector<1x32xf32> to vector<8x32xf32>
    %106 = arith.addf %103, %105 : vector<8x32xf32>
    %c0_32 = arith.constant 0 : index
    %c0_33 = arith.constant 0 : index
    %107 = vector.load %arg11[%c0_32, %c0_33] : memref<1x32xf32, #tpu.memory_space<vmem>>, vector<1x32xf32>
    %c0_34 = arith.constant 0 : index
    %c0_35 = arith.constant 0 : index
    %108 = vector.load %arg12[%c0_34, %c0_35] : memref<1x32xf32, #tpu.memory_space<vmem>>, vector<1x32xf32>
    %cst_36 = arith.constant dense<0.000000e+00> : vector<8xf32>
    %109 = vector.multi_reduction <add>, %106, %cst_36 [1] : vector<8x32xf32> to vector<8xf32>
    %110 = vector.shape_cast %109 : vector<8xf32> to vector<8x1xf32>
    %cst_37 = arith.constant 3.200000e+01 : f32
    %111 = vector.broadcast %cst_37 : f32 to vector<8x1xf32>
    %112 = arith.divf %110, %111 : vector<8x1xf32>
    %113 = vector.broadcast %112 : vector<8x1xf32> to vector<8x32xf32>
    %114 = arith.subf %106, %113 : vector<8x32xf32>
    %115 = arith.mulf %114, %114 : vector<8x32xf32>
    %cst_38 = arith.constant dense<0.000000e+00> : vector<8xf32>
    %116 = vector.multi_reduction <add>, %115, %cst_38 [1] : vector<8x32xf32> to vector<8xf32>
    %117 = vector.shape_cast %116 : vector<8xf32> to vector<8x1xf32>
    %cst_39 = arith.constant 3.100000e+01 : f32
    %118 = vector.broadcast %cst_39 : f32 to vector<8x1xf32>
    %119 = arith.divf %117, %118 : vector<8x1xf32>
    %120 = math.sqrt %119 : vector<8x1xf32>
    %121 = vector.broadcast %112 : vector<8x1xf32> to vector<8x32xf32>
    %122 = arith.subf %106, %121 : vector<8x32xf32>
    %123 = vector.broadcast %107 : vector<1x32xf32> to vector<8x32xf32>
    %124 = arith.mulf %123, %122 : vector<8x32xf32>
    %cst_40 = arith.constant 9.99999997E-7 : f32
    %125 = vector.broadcast %cst_40 : f32 to vector<8x1xf32>
    %126 = arith.addf %120, %125 : vector<8x1xf32>
    %127 = vector.broadcast %126 : vector<8x1xf32> to vector<8x32xf32>
    %128 = arith.divf %124, %127 : vector<8x32xf32>
    %129 = vector.broadcast %108 : vector<1x32xf32> to vector<8x32xf32>
    %130 = arith.addf %128, %129 : vector<8x32xf32>
    %131 = arith.truncf %130 : vector<8x32xf32> to vector<8x32xbf16>
    %c0_41 = arith.constant 0 : index
    %c0_42 = arith.constant 0 : index
    %132 = vector.load %arg13[%c0_41, %c0_42] : memref<32x32xbf16, #tpu.memory_space<vmem>>, vector<32x32xbf16>
    %cst_43 = arith.constant dense<0.000000e+00> : vector<8x32xf32>
    %133 = tpu.matmul %131, %132, %cst_43 {dimension_numbers = #tpu.dot_dimension_numbers<[1], [0], [0], [1], [0, 0, 1, 1], [], []>} : vector<8x32xbf16>, vector<32x32xbf16>, vector<8x32xf32> -> vector<8x32xf32>
    %c0_44 = arith.constant 0 : index
    %c0_45 = arith.constant 0 : index
    %134 = vector.load %arg14[%c0_44, %c0_45] : memref<1x32xf32, #tpu.memory_space<vmem>>, vector<1x32xf32>
    %135 = vector.broadcast %134 : vector<1x32xf32> to vector<8x32xf32>
    %136 = arith.addf %133, %135 : vector<8x32xf32>
    %c0_46 = arith.constant 0 : index
    %c0_47 = arith.constant 0 : index
    %137 = vector.load %arg15[%c0_46, %c0_47] : memref<32x64xbf16, #tpu.memory_space<vmem>>, vector<32x64xbf16>
    %cst_48 = arith.constant dense<0.000000e+00> : vector<8x64xf32>
    %138 = tpu.matmul %4, %137, %cst_48 {dimension_numbers = #tpu.dot_dimension_numbers<[1], [0], [0], [1], [0, 0, 1, 1], [], []>} : vector<8x32xbf16>, vector<32x64xbf16>, vector<8x64xf32> -> vector<8x64xf32>
    %c0_49 = arith.constant 0 : index
    %c0_50 = arith.constant 0 : index
    %139 = vector.load %arg16[%c0_49, %c0_50] : memref<1x64xf32, #tpu.memory_space<vmem>>, vector<1x64xf32>
    %140 = vector.broadcast %139 : vector<1x64xf32> to vector<8x64xf32>
    %141 = arith.addf %138, %140 : vector<8x64xf32>
    %142 = vector.extract_strided_slice %141 {offsets = [0, 0], sizes = [8, 32], strides = [1, 1]} : vector<8x64xf32> to vector<8x32xf32>
    %143 = vector.extract_strided_slice %141 {offsets = [0, 32], sizes = [8, 32], strides = [1, 1]} : vector<8x64xf32> to vector<8x32xf32>
    %c0_51 = arith.constant 0 : index
    %c0_52 = arith.constant 0 : index
    %c0_53 = arith.constant 0 : index
    %144 = vector.load %arg4[%c0_51, %c0_52, %c0_53] : memref<1x8x8xi32, #tpu.memory_space<vmem>>, vector<1x8x8xi32>
    %145 = vector.shape_cast %144 : vector<1x8x8xi32> to vector<8x8xi32>
    %146 = vector.extract_strided_slice %136 {offsets = [0, 0], sizes = [8, 8], strides = [1, 1]} : vector<8x32xf32> to vector<8x8xf32>
    %147 = vector.shape_cast %146 : vector<8x8xf32> to vector<1x8x8xf32>
    %148 = vector.extract_strided_slice %136 {offsets = [0, 8], sizes = [8, 8], strides = [1, 1]} : vector<8x32xf32> to vector<8x8xf32>
    %149 = vector.shape_cast %148 : vector<8x8xf32> to vector<1x8x8xf32>
    %150 = vector.extract_strided_slice %136 {offsets = [0, 16], sizes = [8, 8], strides = [1, 1]} : vector<8x32xf32> to vector<8x8xf32>
    %151 = vector.shape_cast %150 : vector<8x8xf32> to vector<1x8x8xf32>
    %152 = vector.extract_strided_slice %136 {offsets = [0, 24], sizes = [8, 8], strides = [1, 1]} : vector<8x32xf32> to vector<8x8xf32>
    %153 = vector.shape_cast %152 : vector<8x8xf32> to vector<1x8x8xf32>
    %154 = tpu.concatenate %147, %149, %151, %153 in 0 : vector<1x8x8xf32>, vector<1x8x8xf32>, vector<1x8x8xf32>, vector<1x8x8xf32> -> vector<4x8x8xf32>
    %155 = arith.truncf %154 : vector<4x8x8xf32> to vector<4x8x8xbf16>
    %156 = vector.extract_strided_slice %142 {offsets = [0, 0], sizes = [8, 8], strides = [1, 1]} : vector<8x32xf32> to vector<8x8xf32>
    %157 = vector.shape_cast %156 : vector<8x8xf32> to vector<1x8x8xf32>
    %158 = vector.extract_strided_slice %142 {offsets = [0, 8], sizes = [8, 8], strides = [1, 1]} : vector<8x32xf32> to vector<8x8xf32>
    %159 = vector.shape_cast %158 : vector<8x8xf32> to vector<1x8x8xf32>
    %160 = vector.extract_strided_slice %142 {offsets = [0, 16], sizes = [8, 8], strides = [1, 1]} : vector<8x32xf32> to vector<8x8xf32>
    %161 = vector.shape_cast %160 : vector<8x8xf32> to vector<1x8x8xf32>
    %162 = vector.extract_strided_slice %142 {offsets = [0, 24], sizes = [8, 8], strides = [1, 1]} : vector<8x32xf32> to vector<8x8xf32>
    %163 = vector.shape_cast %162 : vector<8x8xf32> to vector<1x8x8xf32>
    %164 = tpu.concatenate %157, %159, %161, %163 in 0 : vector<1x8x8xf32>, vector<1x8x8xf32>, vector<1x8x8xf32>, vector<1x8x8xf32> -> vector<4x8x8xf32>
    %165 = arith.truncf %164 : vector<4x8x8xf32> to vector<4x8x8xbf16>
    %166 = vector.extract_strided_slice %143 {offsets = [0, 0], sizes = [8, 8], strides = [1, 1]} : vector<8x32xf32> to vector<8x8xf32>
    %167 = vector.shape_cast %166 : vector<8x8xf32> to vector<1x8x8xf32>
    %168 = vector.extract_strided_slice %143 {offsets = [0, 8], sizes = [8, 8], strides = [1, 1]} : vector<8x32xf32> to vector<8x8xf32>
    %169 = vector.shape_cast %168 : vector<8x8xf32> to vector<1x8x8xf32>
    %170 = vector.extract_strided_slice %143 {offsets = [0, 16], sizes = [8, 8], strides = [1, 1]} : vector<8x32xf32> to vector<8x8xf32>
    %171 = vector.shape_cast %170 : vector<8x8xf32> to vector<1x8x8xf32>
    %172 = vector.extract_strided_slice %143 {offsets = [0, 24], sizes = [8, 8], strides = [1, 1]} : vector<8x32xf32> to vector<8x8xf32>
    %173 = vector.shape_cast %172 : vector<8x8xf32> to vector<1x8x8xf32>
    %174 = tpu.concatenate %167, %169, %171, %173 in 0 : vector<1x8x8xf32>, vector<1x8x8xf32>, vector<1x8x8xf32>, vector<1x8x8xf32> -> vector<4x8x8xf32>
    %175 = arith.truncf %174 : vector<4x8x8xf32> to vector<4x8x8xbf16>
    "tpu.trace_start"() <{level = 10 : i32, message = "hqd,hkd->hqk"}> : () -> ()
    %cst_54 = arith.constant dense<0.000000e+00> : vector<4x8x8xf32>
    %176 = tpu.matmul %155, %165, %cst_54 {dimension_numbers = #tpu.dot_dimension_numbers<[2], [2], [1], [1], [0, 0, 0, 1, 1, 1], [0], [0]>} : vector<4x8x8xbf16>, vector<4x8x8xbf16>, vector<4x8x8xf32> -> vector<4x8x8xf32>
    "tpu.trace_stop"() : () -> ()
    %cst_55 = arith.constant 0.353553385 : f32
    %177 = vector.broadcast %cst_55 : f32 to vector<4x8x8xf32>
    %178 = arith.mulf %176, %177 : vector<4x8x8xf32>
    %c0_i32_56 = arith.constant 0 : i32
    %179 = vector.broadcast %c0_i32_56 : i32 to vector<8x8xi32>
    %180 = arith.cmpi eq, %145, %179 : vector<8x8xi32>
    %cst_57 = arith.constant -1.000000e+09 : f32
    %181 = vector.shape_cast %180 : vector<8x8xi1> to vector<1x8x8xi1>
    %182 = vector.broadcast %181 : vector<1x8x8xi1> to vector<4x8x8xi1>
    %183 = vector.broadcast %cst_57 : f32 to vector<4x8x8xf32>
    %184 = arith.select %182, %183, %178 : vector<4x8x8xi1>, vector<4x8x8xf32>
    %cst_58 = arith.constant dense<0xFF800000> : vector<4x8xf32>
    %185 = vector.multi_reduction <maximumf>, %184, %cst_58 [2] : vector<4x8x8xf32> to vector<4x8xf32>
    %186 = vector.shape_cast %185 : vector<4x8xf32> to vector<4x8x1xf32>
    %187 = vector.broadcast %186 : vector<4x8x1xf32> to vector<4x8x8xf32>
    %188 = arith.subf %184, %187 : vector<4x8x8xf32>
    %189 = math.exp %188 : vector<4x8x8xf32>
    %cst_59 = arith.constant dense<0.000000e+00> : vector<4x8xf32>
    %190 = vector.multi_reduction <add>, %189, %cst_59 [2] : vector<4x8x8xf32> to vector<4x8xf32>
    %191 = vector.shape_cast %190 : vector<4x8xf32> to vector<4x8x1xf32>
    %192 = tpu.reciprocal %191 {approx = true} : vector<4x8x1xf32> -> vector<4x8x1xf32>
    %193 = vector.broadcast %192 : vector<4x8x1xf32> to vector<4x8x8xf32>
    %194 = arith.mulf %189, %193 : vector<4x8x8xf32>
    %195 = arith.truncf %194 : vector<4x8x8xf32> to vector<4x8x8xbf16>
    "tpu.trace_start"() <{level = 10 : i32, message = "hqk,hkd->hqd"}> : () -> ()
    %cst_60 = arith.constant dense<0.000000e+00> : vector<4x8x8xf32>
    %196 = tpu.matmul %195, %175, %cst_60 {dimension_numbers = #tpu.dot_dimension_numbers<[2], [1], [1], [2], [0, 0, 0, 1, 1, 2], [0], [0]>} : vector<4x8x8xbf16>, vector<4x8x8xbf16>, vector<4x8x8xf32> -> vector<4x8x8xf32>
    "tpu.trace_stop"() : () -> ()
    %197 = vector.extract_strided_slice %196 {offsets = [0, 0, 0], sizes = [1, 8, 8], strides = [1, 1, 1]} : vector<4x8x8xf32> to vector<1x8x8xf32>
    %198 = vector.shape_cast %197 : vector<1x8x8xf32> to vector<8x8xf32>
    %199 = vector.extract_strided_slice %196 {offsets = [1, 0, 0], sizes = [1, 8, 8], strides = [1, 1, 1]} : vector<4x8x8xf32> to vector<1x8x8xf32>
    %200 = vector.shape_cast %199 : vector<1x8x8xf32> to vector<8x8xf32>
    %201 = vector.extract_strided_slice %196 {offsets = [2, 0, 0], sizes = [1, 8, 8], strides = [1, 1, 1]} : vector<4x8x8xf32> to vector<1x8x8xf32>
    %202 = vector.shape_cast %201 : vector<1x8x8xf32> to vector<8x8xf32>
    %203 = vector.extract_strided_slice %196 {offsets = [3, 0, 0], sizes = [1, 8, 8], strides = [1, 1, 1]} : vector<4x8x8xf32> to vector<1x8x8xf32>
    %204 = vector.shape_cast %203 : vector<1x8x8xf32> to vector<8x8xf32>
    %205 = tpu.concatenate %198, %200, %202, %204 in 1 : vector<8x8xf32>, vector<8x8xf32>, vector<8x8xf32>, vector<8x8xf32> -> vector<8x32xf32>
    %206 = arith.truncf %205 : vector<8x32xf32> to vector<8x32xbf16>
    %c0_61 = arith.constant 0 : index
    %c0_62 = arith.constant 0 : index
    %207 = vector.load %arg17[%c0_61, %c0_62] : memref<32x32xbf16, #tpu.memory_space<vmem>>, vector<32x32xbf16>
    %cst_63 = arith.constant dense<0.000000e+00> : vector<8x32xf32>
    %208 = tpu.matmul %206, %207, %cst_63 {dimension_numbers = #tpu.dot_dimension_numbers<[1], [0], [0], [1], [0, 0, 1, 1], [], []>} : vector<8x32xbf16>, vector<32x32xbf16>, vector<8x32xf32> -> vector<8x32xf32>
    %209 = arith.addf %106, %208 : vector<8x32xf32>
    %c0_64 = arith.constant 0 : index
    %c0_65 = arith.constant 0 : index
    %210 = vector.load %arg18[%c0_64, %c0_65] : memref<1x32xf32, #tpu.memory_space<vmem>>, vector<1x32xf32>
    %211 = vector.broadcast %210 : vector<1x32xf32> to vector<8x32xf32>
    %212 = arith.addf %209, %211 : vector<8x32xf32>
    %c0_66 = arith.constant 0 : index
    %c0_67 = arith.constant 0 : index
    %213 = vector.load %arg19[%c0_66, %c0_67] : memref<1x32xf32, #tpu.memory_space<vmem>>, vector<1x32xf32>
    %c0_68 = arith.constant 0 : index
    %c0_69 = arith.constant 0 : index
    %214 = vector.load %arg20[%c0_68, %c0_69] : memref<1x32xf32, #tpu.memory_space<vmem>>, vector<1x32xf32>
    %cst_70 = arith.constant dense<0.000000e+00> : vector<8xf32>
    %215 = vector.multi_reduction <add>, %212, %cst_70 [1] : vector<8x32xf32> to vector<8xf32>
    %216 = vector.shape_cast %215 : vector<8xf32> to vector<8x1xf32>
    %cst_71 = arith.constant 3.200000e+01 : f32
    %217 = vector.broadcast %cst_71 : f32 to vector<8x1xf32>
    %218 = arith.divf %216, %217 : vector<8x1xf32>
    %219 = vector.broadcast %218 : vector<8x1xf32> to vector<8x32xf32>
    %220 = arith.subf %212, %219 : vector<8x32xf32>
    %221 = arith.mulf %220, %220 : vector<8x32xf32>
    %cst_72 = arith.constant dense<0.000000e+00> : vector<8xf32>
    %222 = vector.multi_reduction <add>, %221, %cst_72 [1] : vector<8x32xf32> to vector<8xf32>
    %223 = vector.shape_cast %222 : vector<8xf32> to vector<8x1xf32>
    %cst_73 = arith.constant 3.100000e+01 : f32
    %224 = vector.broadcast %cst_73 : f32 to vector<8x1xf32>
    %225 = arith.divf %223, %224 : vector<8x1xf32>
    %226 = math.sqrt %225 : vector<8x1xf32>
    %227 = vector.broadcast %218 : vector<8x1xf32> to vector<8x32xf32>
    %228 = arith.subf %212, %227 : vector<8x32xf32>
    %229 = vector.broadcast %213 : vector<1x32xf32> to vector<8x32xf32>
    %230 = arith.mulf %229, %228 : vector<8x32xf32>
    %cst_74 = arith.constant 9.99999997E-7 : f32
    %231 = vector.broadcast %cst_74 : f32 to vector<8x1xf32>
    %232 = arith.addf %226, %231 : vector<8x1xf32>
    %233 = vector.broadcast %232 : vector<8x1xf32> to vector<8x32xf32>
    %234 = arith.divf %230, %233 : vector<8x32xf32>
    %235 = vector.broadcast %214 : vector<1x32xf32> to vector<8x32xf32>
    %236 = arith.addf %234, %235 : vector<8x32xf32>
    %237 = arith.truncf %236 : vector<8x32xf32> to vector<8x32xbf16>
    %c0_75 = arith.constant 0 : index
    %c0_76 = arith.constant 0 : index
    %238 = vector.load %arg21[%c0_75, %c0_76] : memref<32x64xbf16, #tpu.memory_space<vmem>>, vector<32x64xbf16>
    %cst_77 = arith.constant dense<0.000000e+00> : vector<8x64xf32>
    %239 = tpu.matmul %237, %238, %cst_77 {dimension_numbers = #tpu.dot_dimension_numbers<[1], [0], [0], [1], [0, 0, 1, 1], [], []>} : vector<8x32xbf16>, vector<32x64xbf16>, vector<8x64xf32> -> vector<8x64xf32>
    %c0_78 = arith.constant 0 : index
    %c0_79 = arith.constant 0 : index
    %240 = vector.load %arg22[%c0_78, %c0_79] : memref<1x64xf32, #tpu.memory_space<vmem>>, vector<1x64xf32>
    %241 = vector.broadcast %240 : vector<1x64xf32> to vector<8x64xf32>
    %242 = arith.addf %239, %241 : vector<8x64xf32>
    %cst_80 = arith.constant 0.000000e+00 : f32
    %243 = vector.broadcast %cst_80 : f32 to vector<8x64xf32>
    %244 = arith.maximumf %242, %243 : vector<8x64xf32>
    %245 = arith.truncf %244 : vector<8x64xf32> to vector<8x64xbf16>
    %c0_81 = arith.constant 0 : index
    %c0_82 = arith.constant 0 : index
    %246 = vector.load %arg23[%c0_81, %c0_82] : memref<64x32xbf16, #tpu.memory_space<vmem>>, vector<64x32xbf16>
    %cst_83 = arith.constant dense<0.000000e+00> : vector<8x32xf32>
    %247 = tpu.matmul %245, %246, %cst_83 {dimension_numbers = #tpu.dot_dimension_numbers<[1], [0], [0], [1], [0, 0, 1, 1], [], []>} : vector<8x64xbf16>, vector<64x32xbf16>, vector<8x32xf32> -> vector<8x32xf32>
    %c0_84 = arith.constant 0 : index
    %c0_85 = arith.constant 0 : index
    %248 = vector.load %arg24[%c0_84, %c0_85] : memref<1x32xf32, #tpu.memory_space<vmem>>, vector<1x32xf32>
    %249 = vector.broadcast %248 : vector<1x32xf32> to vector<8x32xf32>
    %250 = arith.addf %247, %249 : vector<8x32xf32>
    %251 = arith.addf %212, %250 : vector<8x32xf32>
    %c0_86 = arith.constant 0 : index
    %c0_87 = arith.constant 0 : index
    %c0_88 = arith.constant 0 : index
    %252 = vector.load %arg25[%c0_86, %c0_87, %c0_88] : memref<1x8x32xf32, #tpu.memory_space<vmem>>, vector<1x8x32xf32>
    %253 = vector.shape_cast %252 : vector<1x8x32xf32> to vector<8x32xf32>
    %254 = vector.shape_cast %251 : vector<8x32xf32> to vector<1x8x32xf32>
    tpu.vector_store %arg25[%c0_86, %c0_87, %c0_88], %254 {strides = array<i32>} : memref<1x8x32xf32, #tpu.memory_space<vmem>>, vector<1x8x32xf32>,
    return
  }
  func.func @transform_0(%arg0: i32) -> (i32, i32, i32) {
    %c0_i32 = arith.constant 0 : i32
    %c0_i32_0 = arith.constant 0 : i32
    %c0_i32_1 = arith.constant 0 : i32
    return %arg0, %c0_i32, %c0_i32_0 : i32, i32, i32
  }
  func.func @transform_1(%arg0: i32) -> (i32, i32, i32) {
    %c0_i32 = arith.constant 0 : i32
    %c0_i32_0 = arith.constant 0 : i32
    %c0_i32_1 = arith.constant 0 : i32
    return %arg0, %c0_i32, %c0_i32_0 : i32, i32, i32
  }
  func.func @transform_2(%arg0: i32) -> (i32, i32, i32) {
    %c0_i32 = arith.constant 0 : i32
    %c0_i32_0 = arith.constant 0 : i32
    %c0_i32_1 = arith.constant 0 : i32
    return %arg0, %c0_i32, %c0_i32_0 : i32, i32, i32
  }
  func.func @transform_3(%arg0: i32) -> (i32, i32, i32) {
    %c0_i32 = arith.constant 0 : i32
    %c0_i32_0 = arith.constant 0 : i32
    %c0_i32_1 = arith.constant 0 : i32
    return %arg0, %c0_i32, %c0_i32_0 : i32, i32, i32
  }
  func.func @transform_4(%arg0: i32) -> (i32, i32) {
    %c0_i32 = arith.constant 0 : i32
    %c0_i32_0 = arith.constant 0 : i32
    %c0_i32_1 = arith.constant 0 : i32
    return %c0_i32, %c0_i32_0 : i32, i32
  }
  func.func @transform_5(%arg0: i32) -> (i32, i32) {
    %c0_i32 = arith.constant 0 : i32
    %c0_i32_0 = arith.constant 0 : i32
    %c0_i32_1 = arith.constant 0 : i32
    return %c0_i32, %c0_i32_0 : i32, i32
  }
  func.func @transform_6(%arg0: i32) -> (i32, i32) {
    %c0_i32 = arith.constant 0 : i32
    %c0_i32_0 = arith.constant 0 : i32
    %c0_i32_1 = arith.constant 0 : i32
    return %c0_i32, %c0_i32_0 : i32, i32
  }
  func.func @transform_7(%arg0: i32) -> (i32, i32) {
    %c0_i32 = arith.constant 0 : i32
    %c0_i32_0 = arith.constant 0 : i32
    %c0_i32_1 = arith.constant 0 : i32
    return %c0_i32, %c0_i32_0 : i32, i32
  }
  func.func @transform_8(%arg0: i32) -> (i32, i32) {
    %c0_i32 = arith.constant 0 : i32
    %c0_i32_0 = arith.constant 0 : i32
    %c0_i32_1 = arith.constant 0 : i32
    return %c0_i32, %c0_i32_0 : i32, i32
  }
  func.func @transform_9(%arg0: i32) -> (i32, i32) {
    %c0_i32 = arith.constant 0 : i32
    %c0_i32_0 = arith.constant 0 : i32
    %c0_i32_1 = arith.constant 0 : i32
    return %c0_i32, %c0_i32_0 : i32, i32
  }
  func.func @transform_10(%arg0: i32) -> (i32, i32) {
    %c0_i32 = arith.constant 0 : i32
    %c0_i32_0 = arith.constant 0 : i32
    %c0_i32_1 = arith.constant 0 : i32
    return %c0_i32, %c0_i32_0 : i32, i32
  }
  func.func @transform_11(%arg0: i32) -> (i32, i32) {
    %c0_i32 = arith.constant 0 : i32
    %c0_i32_0 = arith.constant 0 : i32
    %c0_i32_1 = arith.constant 0 : i32
    return %c0_i32, %c0_i32_0 : i32, i32
  }
  func.func @transform_12(%arg0: i32) -> (i32, i32) {
    %c0_i32 = arith.constant 0 : i32
    %c0_i32_0 = arith.constant 0 : i32
    %c0_i32_1 = arith.constant 0 : i32
    return %c0_i32, %c0_i32_0 : i32, i32
  }
  func.func @transform_13(%arg0: i32) -> (i32, i32) {
    %c0_i32 = arith.constant 0 : i32
    %c0_i32_0 = arith.constant 0 : i32
    %c0_i32_1 = arith.constant 0 : i32
    return %c0_i32, %c0_i32_0 : i32, i32
  }
  func.func @transform_14(%arg0: i32) -> (i32, i32) {
    %c0_i32 = arith.constant 0 : i32
    %c0_i32_0 = arith.constant 0 : i32
    %c0_i32_1 = arith.constant 0 : i32
    return %c0_i32, %c0_i32_0 : i32, i32
  }
  func.func @transform_15(%arg0: i32) -> (i32, i32) {
    %c0_i32 = arith.constant 0 : i32
    %c0_i32_0 = arith.constant 0 : i32
    %c0_i32_1 = arith.constant 0 : i32
    return %c0_i32, %c0_i32_0 : i32, i32
  }
  func.func @transform_16(%arg0: i32) -> (i32, i32) {
    %c0_i32 = arith.constant 0 : i32
    %c0_i32_0 = arith.constant 0 : i32
    %c0_i32_1 = arith.constant 0 : i32
    return %c0_i32, %c0_i32_0 : i32, i32
  }
  func.func @transform_17(%arg0: i32) -> (i32, i32) {
    %c0_i32 = arith.constant 0 : i32
    %c0_i32_0 = arith.constant 0 : i32
    %c0_i32_1 = arith.constant 0 : i32
    return %c0_i32, %c0_i32_0 : i32, i32
  }
  func.func @transform_18(%arg0: i32) -> (i32, i32) {
    %c0_i32 = arith.constant 0 : i32
    %c0_i32_0 = arith.constant 0 : i32
    %c0_i32_1 = arith.constant 0 : i32
    return %c0_i32, %c0_i32_0 : i32, i32
  }
  func.func @transform_19(%arg0: i32) -> (i32, i32) {
    %c0_i32 = arith.constant 0 : i32
    %c0_i32_0 = arith.constant 0 : i32
    %c0_i32_1 = arith.constant 0 : i32
    return %c0_i32, %c0_i32_0 : i32, i32
  }
  func.func @transform_20(%arg0: i32) -> (i32, i32) {
    %c0_i32 = arith.constant 0 : i32
    %c0_i32_0 = arith.constant 0 : i32
    %c0_i32_1 = arith.constant 0 : i32
    return %c0_i32, %c0_i32_0 : i32, i32
  }
  func.func @transform_21(%arg0: i32) -> (i32, i32) {
    %c0_i32 = arith.constant 0 : i32
    %c0_i32_0 = arith.constant 0 : i32
    %c0_i32_1 = arith.constant 0 : i32
    return %c0_i32, %c0_i32_0 : i32, i32
  }
  func.func @transform_22(%arg0: i32) -> (i32, i32) {
    %c0_i32 = arith.constant 0 : i32
    %c0_i32_0 = arith.constant 0 : i32
    %c0_i32_1 = arith.constant 0 : i32
    return %c0_i32, %c0_i32_0 : i32, i32
  }
  func.func @transform_23(%arg0: i32) -> (i32, i32) {
    %c0_i32 = arith.constant 0 : i32
    %c0_i32_0 = arith.constant 0 : i32
    %c0_i32_1 = arith.constant 0 : i32
    return %c0_i32, %c0_i32_0 : i32, i32
  }
  func.func @transform_24(%arg0: i32) -> (i32, i32, i32) {
    %c0_i32 = arith.constant 0 : i32
    %c0_i32_0 = arith.constant 0 : i32
    %c0_i32_1 = arith.constant 0 : i32
    return %arg0, %c0_i32, %c0_i32_0 : i32, i32, i32
  }
}

</mosaic_0001>

<bundles_post_ra>
// kernel: decoder_layer.1
= control target key start
LH: loop header
LB: loop body
LE: loop exit
PB: predicated region body
PF: predicated region fallthrough
CT: control target
= control target key end

     0   :  { %s3902_s0 = inlined_call_operand.vmem [shape: f32[2,8,32], index: 0, kind: input, shape index: {}]   ;;  %s3903_s1 = inlined_call_operand.vmem [shape: f32[2,8,32], index: 1, kind: input, shape index: {}]   ;;  %s3904_s2 = inlined_call_operand.vmem [shape: s32[2,8,8], index: 2, kind: input, shape index: {}]   ;;  %s3905_s3 = inlined_call_operand.hbm [shape: s32[2,8,8], index: 3, kind: input, shape index: {}]   ;;  %s3906_s4 = inlined_call_operand.hbm [shape: f32[1,32], index: 4, kind: input, shape index: {}]   ;;  %s3907_s5 = inlined_call_operand.hbm [shape: f32[1,32], index: 5, kind: input, shape index: {}]   ;;  %s3908_s6 = inlined_call_operand.hbm [shape: bf16[32,96], index: 6, kind: input, shape index: {}]   ;;  %s3909_s7 = inlined_call_operand.hbm [shape: f32[1,96], index: 7, kind: input, shape index: {}]   ;;  %s3910_s8 = inlined_call_operand.hbm [shape: bf16[32,32], index: 8, kind: input, shape index: {}]   ;;  %s3911_s9 = inlined_call_operand.hbm [shape: f32[1,32], index: 9, kind: input, shape index: {}]   ;;  %s3912_s10 = inlined_call_operand.hbm [shape: f32[1,32], index: 10, kind: input, shape index: {}]   ;;  %s3913_s11 = inlined_call_operand.hbm [shape: f32[1,32], index: 11, kind: input, shape index: {}]   ;;  %s3914_s12 = inlined_call_operand.vmem [shape: bf16[32,32], index: 12, kind: input, shape index: {}]   ;;  %s3915_s13 = inlined_call_operand.vmem [shape: f32[1,32], index: 13, kind: input, shape index: {}]   ;;  %s3916_s14 = inlined_call_operand.hbm [shape: bf16[32,64], index: 14, kind: input, shape index: {}]   ;;  %s3917_s15 = inlined_call_operand.vmem [shape: f32[1,64], index: 15, kind: input, shape index: {}]   ;;  %s3918_s16 = inlined_call_operand.hbm [shape: bf16[32,32], index: 16, kind: input, shape index: {}]   ;;  %s3919_s17 = inlined_call_operand.vmem [shape: f32[1,32], index: 17, kind: input, shape index: {}]   ;;  %s3920_s18 = inlined_call_operand.hbm [shape: f32[1,32], index: 18, kind: input, shape index: {}]   ;;  %s3921_s19 = inlined_call_operand.hbm [shape: f32[1,32], index: 19, kind: input, shape index: {}]   ;;  %s3922_s20 = inlined_call_operand.hbm [shape: bf16[32,64], index: 20, kind: input, shape index: {}]   ;;  %s3923_s21 = inlined_call_operand.hbm [shape: f32[1,64], index: 21, kind: input, shape index: {}]   ;;  %s3924_s22 = inlined_call_operand.vmem [shape: bf16[64,32], index: 22, kind: input, shape index: {}]   ;;  %s3925_s23 = inlined_call_operand.hbm [shape: f32[1,32], index: 23, kind: input, shape index: {}]   ;;  %s3926_s24 = inlined_call_operand.hbm [shape: f32[2,8,32], index: 24, kind: output, shape index: {}]  }
   0x1   :  { %3937 = sst [smem:[#allocation39_spill]] %s3902_s0 }
   0x2   :  { %3938 = sst [smem:[#allocation40_spill]] %s3903_s1 }
   0x3   :  { %3939 = sst [smem:[#allocation41_spill]] %s3904_s2 }
   0x4   :  { %3940 = sst [smem:[#allocation42_spill]] %s3905_s3 }
   0x5   :  { %3941 = sst [smem:[#allocation43_spill]] %s3906_s4 }
   0x6   :  { %3942 = sst [smem:[#allocation44_spill]] %s3907_s5 }
   0x7   :  { %3943 = sst [smem:[#allocation45_spill]] %s3908_s6 }
   0x8   :  { %3944 = sst [smem:[#allocation46_spill]] %s3909_s7 }
   0x9   :  { %3945 = sst [smem:[#allocation47_spill]] %s3910_s8 }
   0xa   :  { %3946 = sst [smem:[#allocation48_spill]] %s3911_s9 }
   0xb   :  { %3947 = sst [smem:[#allocation49_spill]] %s3912_s10 }
   0xc   :  { %3948 = sst [smem:[#allocation50_spill]] %s3913_s11 }
   0xd   :  { %3949 = sst [smem:[#allocation51_spill]] %s3914_s12 }
   0xe   :  { %3950 = sst [smem:[#allocation52_spill]] %s3915_s13 }
   0xf   :  { %3951 = sst [smem:[#allocation53_spill]] %s3916_s14 }
  0x10   :  { %3952 = sst [smem:[#allocation54_spill]] %s3917_s15 }
  0x11   :  { %3953 = sst [smem:[#allocation55_spill]] %s3919_s17 }
  0x12   :  { %3954 = sst [smem:[#allocation56_spill]] %s3924_s22 }
  0x13   :  { %3955 = sst [smem:[#allocation57_spill]] %s3926_s24 }
  0x14   :  { %29 = vsyncpa [#allocation3], 0 }
  0x15   :  { %31 = vsyncpa [#allocation3 + $0x1], 0 }
  0x16   :  { %32 = vsyncpa [#allocation6], 0 }
  0x17   :  { %33 = vsyncpa [#allocation9], 0 }
  0x18   :  { %34 = vsyncpa [#allocation12], 0 }
  0x19   :  { %35 = vsyncpa [#allocation15], 0 }
  0x1a   :  { %36 = vsyncpa [#allocation18], 0 }
  0x1b   :  { %37 = vsyncpa [#allocation21], 0 }
  0x1c   :  { %38 = vsyncpa [#allocation24], 0 }
  0x1d   :  { %39 = vsyncpa [#allocation27], 0 }
  0x1e   :  { %40 = vsyncpa [#allocation4], 0 }
  0x1f   :  { %42 = vsyncpa [#allocation4 + $0x1], 0  ;;  %s3442_s5 = smov 0   ;;  %s3444_s26 = smov 0  }
  0x20   :  { %s3446_s27 = smov 0   ;;  %s3448_s28 = smov 0  }
  0x21 LB: > { %s3956_s29 = sld [smem:[#allocation43_spill]]  ;;  %s3466_s7 = sadd.s32 4294967295, %s3288_s28   ;;  %s3288_s28 = sphi %s3448_s28, %s3990_s28   ;;  %s3284_s27 = sphi %s3446_s27, %s3989_s27   ;;  %s3280_s26 = sphi %s3444_s26, %s3988_s26   ;;  %s3276_s5 = sphi %s3442_s5, %s3987_s5  }
  0x22   : > { %p2293_p0 = scmp.ge.s32.totalorder %s3288_s28, 1  ;;  %p147_p1 = scmp.eq.s32.totalorder %s3466_s7, 0 }
  0x23   : > { %p603_p2 = scmp.lt.s32.totalorder %s3288_s28, 3  ;;  %s3290_s3 = smov [#allocation5]  }
  0x24   : > { %s617_s25 = sshll.u32 %s3290_s3, 4  ;;  %s3958_s1 = sld [smem:[#allocation45_spill]]  ;;  %s618_s25 = int_to_ptr.vmem [resolvable:$true] %s617_s25 }
  0x25   : > { %p3471_p3 = pnand %p2293_p0, %p603_p2  ;;  %s3292_s3 = smov 64  }
  0x26   : > { %s3293_s22 = smov 4   ;;  %s3294_s13 = smov [#allocation11]  }
  0x27   : > { %s615_s0 = sshll.u32 %s3956_s29, 4  ;;  %p2504_p5 = pneg %p3471_p3  ;;  %s616_s0 = int_to_ptr.hbm [resolvable:$true] %s615_s0 }
  0x28   : > { %s3291_s29 = smov [#allocation8]   ;;  %s666_s15 = sshll.u32 %s3294_s13, 4  ;;  %s667_s15 = int_to_ptr.vmem [resolvable:$true] %s666_s15 }
  0x29   : > { %p3483_p6 = pnand %p2504_p5, %p147_p1  ;;  %s640_s24 = sshll.u32 %s3291_s29, 4  ;;  %s641_s24 = int_to_ptr.vmem [resolvable:$true] %s640_s24 }
  0x2a   : > { %s638_s6 = sshll.u32 %s3958_s1, 4  ;;  %s3960_s1 = sld [smem:[#allocation47_spill]]  ;;  %s639_s6 = int_to_ptr.hbm [resolvable:$true] %s638_s6 }
  0x2b   : > { %2507 = dma.hbm_to_vmem [thread:$0]  (!%p3483_p6), %s616_s0, 16, %s618_s25, [#allocation6]  }
  0x2c   : > { %2513 = dma.hbm_to_vmem [thread:$0]  (!%p3483_p6), %s639_s6, 256, %s641_s24, [#allocation9], %s3292_s3, %s3292_s3, %s3293_s22  }
  0x2d   : > { %s3961_s10 = sld [smem:[#allocation49_spill]]  ;;  %s3295_s24 = smov [#allocation14]  }
  0x2e   : > { %s693_s25 = sshll.u32 %s3295_s24, 4  ;;  %s3962_s14 = sld [smem:[#allocation53_spill]]  ;;  %s694_s25 = int_to_ptr.vmem [resolvable:$true] %s693_s25 }
  0x2f   : > { %s3296_s29 = smov [#allocation17]   ;;  %s3963_s13 = sld [smem:[#allocation44_spill]] }
  0x30   : > { %s664_s17 = sshll.u32 %s3960_s1, 4  ;;  %s755_s1 = sshll.u32 %s3920_s18, 4  ;;  %s665_s17 = int_to_ptr.hbm [resolvable:$true] %s664_s17  ;;  %s756_s1 = int_to_ptr.hbm [resolvable:$true] %s755_s1 }
  0x31   : > { %2519 = dma.hbm_to_vmem [thread:$0]  (!%p3483_p6), %s665_s17, 256, %s667_s15, [#allocation12], %s3292_s3, %s3292_s3, %s3293_s22  }
  0x32   : > { %s3297_s15 = smov [#allocation20]   ;;  %s3964_s6 = sld [smem:[#allocation46_spill]] }
  0x33   : > { %s691_s0 = sshll.u32 %s3961_s10, 4  ;;  %s722_s10 = sshll.u32 %s3296_s29, 4  ;;  %s692_s0 = int_to_ptr.hbm [resolvable:$true] %s691_s0  ;;  %s723_s10 = int_to_ptr.vmem [resolvable:$true] %s722_s10 }
  0x34   : > { %s720_s4 = sshll.u32 %s3962_s14, 4  ;;  %s757_s17 = sshll.u32 %s3297_s15, 4  ;;  %s721_s4 = int_to_ptr.hbm [resolvable:$true] %s720_s4  ;;  %s758_s17 = int_to_ptr.vmem [resolvable:$true] %s757_s17 }
  0x35   : > { %2525 = dma.hbm_to_vmem [thread:$0]  (!%p3483_p6), %s692_s0, 16, %s694_s25, [#allocation15]  }
  0x36   : > { %2531 = dma.hbm_to_vmem [thread:$0]  (!%p3483_p6), %s721_s4, 256, %s723_s10, [#allocation18], %s3292_s3, %s3292_s3, %s3293_s22  }
  0x37   : > { %s778_s0 = sshll.u32 %s3922_s20, 4  ;;  %s627_s12 = sshll.u32 %s3963_s13, 4  ;;  %s779_s0 = int_to_ptr.hbm [resolvable:$true] %s778_s0  ;;  %s628_s12 = int_to_ptr.hbm [resolvable:$true] %s627_s12 }
  0x38   : > { %2537 = dma.hbm_to_vmem [thread:$0]  (!%p3483_p6), %s756_s1, 16, %s758_s17, [#allocation21]  }
  0x39   : > { %s3298_s29 = smov [#allocation23]   ;;  %s3299_s10 = smov [#allocation7]  }
  0x3a   : > { %s780_s14 = sshll.u32 %s3298_s29, 4  ;;  %s629_s4 = sshll.u32 %s3299_s10, 4  ;;  %s781_s14 = int_to_ptr.vmem [resolvable:$true] %s780_s14  ;;  %s630_s4 = int_to_ptr.vmem [resolvable:$true] %s629_s4 }
  0x3b   : > { %2543 = dma.hbm_to_vmem [thread:$0]  (!%p3483_p6), %s779_s0, 256, %s781_s14, [#allocation24], %s3292_s3, %s3292_s3, %s3293_s22  }
  0x3c   : > { %s653_s1 = sshll.u32 %s3964_s6, 4  ;;  %s3965_s9 = sld [smem:[#allocation48_spill]]  ;;  %s654_s1 = int_to_ptr.hbm [resolvable:$true] %s653_s1 }
  0x3d   : > { %2510 = dma.hbm_to_vmem [thread:$0]  (!%p3483_p6), %s628_s12, 16, %s630_s4, [#allocation6]  }
  0x3e   : > { %s3300_s13 = smov [#allocation10]   ;;  %s3301_s14 = smov [#allocation13]  }
  0x3f   : > { %s655_s29 = sshll.u32 %s3300_s13, 4  ;;  %s681_s0 = sshll.u32 %s3301_s14, 4  ;;  %s656_s29 = int_to_ptr.vmem [resolvable:$true] %s655_s29  ;;  %s682_s0 = int_to_ptr.vmem [resolvable:$true] %s681_s0 }
  0x40   : > { %2516 = dma.hbm_to_vmem [thread:$0]  (!%p3483_p6), %s654_s1, 16, %s656_s29, [#allocation9]  }
  0x41   : > { %s3966_s11 = sld [smem:[#allocation50_spill]]  ;;  %s737_s6 = sshll.u32 %s3918_s16, 4  ;;  %s738_s6 = int_to_ptr.hbm [resolvable:$true] %s737_s6 }
  0x42   : > { %s679_s8 = sshll.u32 %s3965_s9, 4  ;;  %s3302_s17 = smov [#allocation16]   ;;  %s680_s8 = int_to_ptr.hbm [resolvable:$true] %s679_s8 }
  0x43   : > { %2522 = dma.hbm_to_vmem [thread:$0]  (!%p3483_p6), %s680_s8, 16, %s682_s0, [#allocation12]  }
  0x44   : > { %s705_s25 = sshll.u32 %s3302_s17, 4  ;;  %s3303_s1 = smov [#allocation19]   ;;  %s706_s25 = int_to_ptr.vmem [resolvable:$true] %s705_s25 }
  0x45   : > { %s739_s13 = sshll.u32 %s3303_s1, 4  ;;  %s767_s10 = sshll.u32 %s3921_s19, 4  ;;  %s740_s13 = int_to_ptr.vmem [resolvable:$true] %s739_s13  ;;  %s768_s10 = int_to_ptr.hbm [resolvable:$true] %s767_s10 }
  0x46   : > { %2534 = dma.hbm_to_vmem [thread:$0]  (!%p3483_p6), %s738_s6, 256, %s740_s13, [#allocation18], %s3292_s3, %s3292_s3, %s3293_s22  }
  0x47   : > { %s703_s24 = sshll.u32 %s3966_s11, 4  ;;  %s793_s15 = sshll.u32 %s3923_s21, 4  ;;  %s704_s24 = int_to_ptr.hbm [resolvable:$true] %s703_s24  ;;  %s794_s15 = int_to_ptr.hbm [resolvable:$true] %s793_s15 }
  0x48   : > { %2528 = dma.hbm_to_vmem [thread:$0]  (!%p3483_p6), %s704_s24, 16, %s706_s25, [#allocation15]  }
  0x49   : > { %s3304_s24 = smov [#allocation22]   ;;  %s3305_s4 = smov [#allocation25]  }
  0x4a   : > { %s769_s12 = sshll.u32 %s3304_s24, 4  ;;  %s795_s22 = sshll.u32 %s3305_s4, 4  ;;  %s770_s12 = int_to_ptr.vmem [resolvable:$true] %s769_s12  ;;  %s796_s22 = int_to_ptr.vmem [resolvable:$true] %s795_s22 }
  0x4b   : > { %2540 = dma.hbm_to_vmem [thread:$0]  (!%p3483_p6), %s768_s10, 16, %s770_s12, [#allocation21]  }
  0x4c   : > { %s808_s17 = sshll.u32 %s3925_s23, 4  ;;  %s3306_s25 = smov [#allocation26]   ;;  %s809_s17 = int_to_ptr.hbm [resolvable:$true] %s808_s17 }
  0x4d   : > { %2546 = dma.hbm_to_vmem [thread:$0]  (!%p3483_p6), %s794_s15, 16, %s796_s22, [#allocation24]  }
  0x4e   : > { %s810_s1 = sshll.u32 %s3306_s25, 4  ;;  %s2292_s13 = sadd.s32 4294967294, %s3288_s28   ;;  %s811_s1 = int_to_ptr.vmem [resolvable:$true] %s810_s1 }
  0x4f   : > { %2549 = dma.hbm_to_vmem [thread:$0]  (!%p3483_p6), %s809_s17, 16, %s811_s1, [#allocation27]  }
  0x50   : > { %s3573_s29 = sadd.s32 1, %s3288_s28   ;;  %s133_s14 = sadd.s32 1, %s3284_s27 }
  0x51   : > { %s130_s10 = ssub.s32 %s3288_s28, %s3573_s29  ;;  %p140_p7 = scmp.ne.s32.totalorder %s3284_s27, %s3280_s26 }
  0x52   : > { %p131_p8 = scmp.eq.s32.totalorder %s130_s10, 0  ;;  %p141_p9 = scmp.eq.s32.totalorder %s3288_s28, 0 }
  0x53   : > { %p146_p10 = scmp.ne.s32.totalorder %s3280_s26, %s3276_s5  ;;  %p590_p11 = scmp.eq.s32.totalorder %s3466_s7, 1 }
  0x54   : > { %s3585_s8 = scalar_select %p131_p8, %s3284_s27, %s133_s14  }
  0x55   : > { %p3589_p12 = por %p147_p1, %p146_p10  ;;  %p3593_p13 = por %p590_p11, %p140_p7 }
  0x56   : > { %p596_p0 = scmp.eq.s32.totalorder %s2292_s13, 1  ;;  %p142_p2 = por %p141_p9, %p140_p7 }
  0x57   : > { %s842_s15 = sand.u32 1, %s3284_s27   ;;  %p2573_p6 = scmp.lt.s32.totalorder %s3288_s28, 2 }
  0x58   : > { %p3598_p5 = por %p596_p0, %p146_p10  ;;  %s2310_s12 = sshll.u32 %s842_s15, 3 }
  0x59   : > { %s2311_s4 = sshll.u32 %s3288_s28, 3  ;;  %s3970_s6 = sld [smem:[#allocation42_spill]] }
  0x5a   : > { %s846_s1 = scalar_lea.vmem [#allocation2], %s2310_s12  ;;  %p3607_p8 = pnand %p2573_p6, %p142_p2 }
  0x5b   : > { %s854_s14 = sshll.u32 %s846_s1, 4  ;;  %s843_s10 = scalar_lea.sflag [#allocation3], %s842_s15  ;;  %s855_s14 = int_to_ptr.vmem [resolvable:$true] %s854_s14 }
  0x5c   : > { %p3164_p9 = pneg %p3607_p8 }
  0x5f   : > { %s850_s17 = scalar_lea.hbm %s3970_s6, %s2311_s4  ;;  %s3167_s12 = scalar_lea.hbm %s3970_s6, 16 }
  0x60   : > { %s852_s25 = sshll.u32 %s850_s17, 4  ;;  %s853_s25 = int_to_ptr.hbm [resolvable:$true] %s852_s25 }
  0x61   : > { %s3160_s9 = sshra.s32 %s853_s25, 4  ;;  %s3161_s9 = int_to_ptr.hbm [resolvable:$true] %s3160_s9 }
  0x62   : > { %s3162_s11 = scalar_lea.hbm %s3161_s9, 8  ;;  %p3168_p0 = scmp.lt.s32.totalorder %s3161_s9, %s3970_s6 }
  0x63   : > { %p3163_p7 = scmp.ne.s32.totalorder %s3161_s9, %s3162_s11  ;;  %p3169_p2 = scmp.lt.s32.totalorder %s3167_s12, %s3162_s11 }
  0x65   : > { %p3165_p10 = pnand %p3164_p9, %p3163_p7  ;;  %p3170_p6 = por %p3169_p2, %p3168_p0 }
  0x67   : > { %p3166_p11 = pneg %p3165_p10 }
  0x69   : > { %p3171_p4 = pnand %p3170_p6, %p3166_p11 }
  0x6b   : > { %3174 = shalt.err (!%p3171_p4)
}
  0x6c   : > { %2553 = dma.hbm_to_vmem [thread:$0]  (!%p3607_p8), %s853_s25, 128, %s855_s14, %s843_s10  }
  0x6d   : > { %863 = sbr.rel (%p3471_p3) target bundleno = 3446 (0xd76), region = 116  ;;  %s3624_s15 = sand.u32 (!%p3471_p3), 1, %s3280_s26  }
  0x6e   : > { %s3931_s1 = sshll.u32 (!%p3471_p3), %s3624_s15, 3  ;;  %s866_s4 = scalar_lea.sflag (!%p3471_p3), [#allocation3], %s3624_s15 }
  0x6f   : > { %s3630_s9 = scalar_lea.vmem (!%p3471_p3), [#allocation2], %s3931_s1 }
  0x72   : > { %3235 = dma.done.wait (%p3589_p12), %s866_s4, 128  }
  0x73   : > { %3237 = vsyncadd (%p3589_p12), %s866_s4, 4294967168 }
  0x74   : > { %3239 = dma.done.wait (%p147_p1), [#allocation6], 32  }
  0x75   : > { %3241 = vsyncadd (%p147_p1), [#allocation6], 4294967264 }
  0x76   : > { %3243 = dma.done.wait (%p147_p1), [#allocation9], 272  }
  0x77   : > { %3245 = vsyncadd (%p147_p1), [#allocation9], 4294967024 }
  0x78   : > { %3247 = dma.done.wait (%p147_p1), [#allocation12], 272  }
  0x79   : > { %3249 = vsyncadd (%p147_p1), [#allocation12], 4294967024 }
  0x7a   : > { %3251 = dma.done.wait (%p147_p1), [#allocation15], 32  }
  0x7b   : > { %3253 = vsyncadd (%p147_p1), [#allocation15], 4294967264 }
  0x7c   : > { %3255 = dma.done.wait (%p147_p1), [#allocation18], 512  }
  0x7d   : > { %3257 = vsyncadd (%p147_p1), [#allocation18], 4294966784 }
  0x7e   : > { %3259 = dma.done.wait (%p147_p1), [#allocation21], 32  }
  0x7f   : > { %3261 = vsyncadd (%p147_p1), [#allocation21], 4294967264 }
  0x80   : > { %3263 = dma.done.wait (%p147_p1), [#allocation24], 272  }
  0x81   : > { %3265 = vsyncadd (%p147_p1), [#allocation24], 4294967024 }
  0x82   : > { %3267 = dma.done.wait (%p147_p1), [#allocation27], 16  }
  0x83   : > { %3269 = vsyncadd (%p147_p1), [#allocation27], 4294967280  ;;  %p1022_p3 = scmp.lt.s32.totalorder %s3466_s7, 1  ;;  %s3972_s14 = sld [smem:[#allocation39_spill]]  ;;  %vm1040_vm0 = vcmask 261120   ;;  %v3307_v2 = vmov 32.0  }
  0x84   : > { %2662 = vrcp.f32 %v3307_v2  ;;  %v3308_v14 = vmov 31.0   ;;  %v2425_v19 = vld [vmem:[#allocation8 + $0x8] sm:$0xff]  ;;  %v2424_v20 = vld [vmem:[#allocation8] sm:$0xff]  ;;  %v2649_v40 = vld [vmem:[#allocation5] ss:$0 sm:$0xff]  ;;  %s3309_s10 = smov 104  }
  0x85   : > { %s1023_s11 = scalar_select %p1022_p3, %s3466_s7, 1  ;;  %2664 = vrcp.f32 %v3308_v14  ;;  %1131 = vmatpush.bf16.msra.mxu0 %v2425_v19  ;;  %v2650_v47 = vld [vmem:[#allocation7] ss:$0 sm:$0xff]  ;;  %v2651_v52 = vld [vmem:[#allocation10] ss:$0 sm:$0xff]  ;;  %vm1158_vm9 = vcmask 64512  }
  0x86   : > { %s3310_s22 = smov 120   ;;  %s3311_s12 = smov 112   ;;  %vm1314_vm11 = vcmask 1043456   ;;  %vm1407_vm12 = vcmask 130048   ;;  %vm1409_vm13 = vcmask 195584  }
  0x87   : > { %s3670_s30 = sshll.u32 %s1023_s11, 3  ;;  %s3935_s3 = smov 96  }
  0x88   : > { %s3973_s11 = sld [smem:[#allocation41_spill]]  ;;  %s3313_s25 = smov 64  }
  0x89   : > { %s1025_s13 = scalar_lea.vmem %s3972_s14, %s3670_s30  ;;  %1132 = vmatpush.bf16.msra.mxu0 %v2424_v20  ;;  %s3933_s14 = smov 8  }
  0x8a   : > { %v3676_v0 = vld [vmem:[%s1025_s13] sm:$0xff]  ;;  %v2663_v3 = vpop.eup %2662  ;;  %s3932_s13 = smov 24   ;;  %s3934_s17 = smov 16  }
  0x8b   : > { %v1041_v1 = vsel %vm1040_vm0, %v3676_v0, 0.0  ;;  %v1045_v4 = vmul.f32 32.0, %v2663_v3  ;;  %vm1049_vm1 = vweird.f32 %v2663_v3  ;;  %v2665_v15 = vpop.eup %2664  ;;  %s3977_s4 = sld [smem:[#allocation52_spill]] }
  0x8c   : > { %1042 = vadd.xlane.f32.xlu0 %v1041_v1  ;;  %v1058_v16 = vmul.f32 31.0, %v2665_v15  ;;  %vm1062_vm2 = vweird.f32 %v2665_v15 }
  0x8d   : > { %v1046_v5 = vsub.f32 1.0, %v1045_v4 }
  0x8e   : > { %v1059_v17 = vsub.f32 1.0, %v1058_v16  ;;  %s1033_s2 = scalar_lea.vmem %s3973_s11, %s3670_s30 }
  0x8f   : > { %v1047_v6 = vmul.f32 %v2663_v3, %v1046_v5 }
  0x90   : > { %v1060_v18 = vmul.f32 %v2665_v15, %v1059_v17  ;;  %v1138_v17 = vld [vmem:[%s1033_s2] sm:$0xff]  ;;  %s3974_s2 = sld [smem:[#allocation40_spill]] }
  0x91   : > { %v1048_v7 = vadd.f32 %v2663_v3, %v1047_v6  ;;  %vm1254_vm10 = vcmp.eq.s32.totalorder %v1138_v17, 0 }
  0x92   : > { %v1061_v21 = vadd.f32 %v2665_v15, %v1060_v18 }
  0x93   : > { %v3680_v8 = vsel %vm1049_vm1, %v2663_v3, %v1048_v7 }
  0x94   : > { %v3685_v22 = vsel %vm1062_vm2, %v2665_v15, %v1061_v21 }
  0xff   : > { %v1043_v9 = vpop.xlane.xlu0 %1042 }
 0x100   : > { %v1051_v10 = vmul.f32 %v3680_v8, %v1043_v9 }
 0x102   : > { %v1052_v11 = vsub.f32 %v3676_v0, %v1051_v10 }
 0x104   : > { %v1053_v12 = vmul.f32 %v1052_v11, %v1052_v11  ;;  %v1080_v45 = vmul.f32 %v2649_v40, %v1052_v11 }
 0x106   : > { %v1054_v13 = vsel %vm1040_vm0, %v1053_v12, 0.0 }
 0x107   : > { %1055 = vadd.xlane.f32.xlu0 %v1054_v13 }
 0x17a   : > { %v1056_v23 = vpop.xlane.xlu0 %1055 }
 0x17b   : > { %v1064_v24 = vmul.f32 %v3685_v22, %v1056_v23 }
 0x17d   : > { %2666 = vrsqrt.f32 %v1064_v24  ;;  %vm1072_vm3 = vcmp.eq.f32.partialorder %v1064_v24, inf  ;;  %v1075_v32 = vand.u32 2147483648, %v1064_v24  ;;  %vm1074_vm4 = vcmp.eq.f32.partialorder %v1064_v24, 0.0 }
 0x183   : > { %v2667_v25 = vpop.eup %2666 }
 0x184   : > { %v1066_v26 = vmul.f32 %v2667_v25, %v1064_v24 }
 0x186   : > { %v1067_v27 = vmul.f32 %v2667_v25, %v1066_v26 }
 0x188   : > { %v1068_v28 = vmul.f32 0.5, %v1067_v27 }
 0x18a   : > { %v1069_v29 = vsub.f32 1.5, %v1068_v28 }
 0x18c   : > { %v1070_v30 = vmul.f32 %v2667_v25, %v1069_v29 }
 0x18e   : > { %v1071_v31 = vmul.f32 %v1070_v30, %v1064_v24 }
 0x190   : > { %v1073_v33 = vsel %vm1072_vm3, %v1064_v24, %v1071_v31 }
 0x191   : > { %v1076_v34 = vsel %vm1074_vm4, %v1075_v32, %v1073_v33 }
 0x192   : > { %v1081_v35 = vadd.f32 1e-06, %v1076_v34 }
 0x194   : > { %2668 = vrcp.f32 %v1081_v35  ;;  %v1093_v39 = vand.u32 2147483648, %v1081_v35  ;;  %v1091_v42 = vand.u32 2147483647, %v1081_v35  ;;  %vm1087_vm6 = vweird.f32 %v1081_v35 }
 0x196   : > { %v1094_v44 = vor.u32 1.1754944e-38, %v1093_v39  ;;  %vm1092_vm8 = vcmp.eq.f32.partialorder %v1091_v42, 8.507059e+37 }
 0x19a   : > { %v2669_v36 = vpop.eup %2668 }
 0x19b   : > { %v1083_v37 = vmul.f32 %v2669_v36, %v1081_v35  ;;  %vm1088_vm5 = vweird.f32 %v2669_v36 }
 0x19c   : > { %vm1089_vm7 = vmor %vm1087_vm6, %vm1088_vm5 }
 0x19d   : > { %v1084_v38 = vsub.f32 1.0, %v1083_v37 }
 0x19f   : > { %v1085_v41 = vmul.f32 %v2669_v36, %v1084_v38 }
 0x1a1   : > { %v1086_v43 = vadd.f32 %v2669_v36, %v1085_v41 }
 0x1a3   : > { %v1090_v46 = vsel %vm1089_vm7, %v2669_v36, %v1086_v43 }
 0x1a4   : > { %v1095_v48 = vsel %vm1092_vm8, %v1094_v44, %v1090_v46 }
 0x1a5   : > { %v1096_v49 = vmul.f32 %v1095_v48, %v1080_v45 }
 0x1a7   : > { %v1100_v50 = vadd.f32 %v2650_v47, %v1096_v49 }
 0x1a9   : > { %v1101_v51 = vpack.c.bf16 %v1100_v50, %v1100_v50 }
 0x1ab   : > { %2341 = vmatmul.msk.bf16.vlgmr.msra.gmra.mxu0 %vm1040_vm0, %v1101_v51 }
 0x228   : > { %v1134_v53 = vpop.f32.mrf.mxu0 }
 0x229   : > { %v1135_v54 = vadd.f32 %v2651_v52, %v1134_v53 }
 0x22b   : > { %1146 = vrot.lane.b32.xlu2 %v1135_v54, %s3309_s10  ;;  %1140 = vrot.lane.b32.xlu1 %v1135_v54, %s3310_s22  ;;  %v1149_v1 = vpack.c.bf16 %v1135_v54, %v1135_v54 }
 0x22d   : > { %v1154_v4 = vunpack.c.l.b16 %v1149_v1 }
 0x22f   : > { %v3699_v7 = vpack.c.b16 %v1154_v4, %v1154_v4 }
 0x230   : > { %v1136_v55 = vpop.f32.mrf.mxu0 }
 0x233   : > { %1143 = vrot.lane.b32.xlu1 %v1135_v54, %s3311_s12 }
 0x285   : > { %v1147_v56 = vpop.permute.xlu2 %1146 }
 0x286   : > { %v1152_v57 = vpack.c.bf16 %v1147_v56, %v1147_v56 }
 0x288   : > { %v1227_v58 = vunpack.c.l.b16 %v1152_v57 }
 0x28a   : > { %v3692_v59 = vpack.c.b16 %v1227_v58, %v1227_v58 }
 0x28c   : > { %1229 = vrot.lane.b32.xlu1 %v3692_v59, %s3935_s3 }
 0x29d   : > { %v1141_v60 = vpop.permute.xlu1 %1140 }
 0x29e   : > { %v1150_v61 = vpack.c.bf16 %v1141_v60, %v1141_v60 }
 0x2a0   : > { %v1179_v62 = vunpack.c.l.b16 %v1150_v61 }
 0x2a2   : > { %v1180_v63 = vpack.c.b16 %v1179_v62, %v1179_v62 }
 0x2a4   : > { %1181 = vrot.lane.b32.xlu2 %v1180_v63, %s3935_s3 }
 0x2a5   : > { %v1144_v2 = vpop.permute.xlu1 %1143 }
 0x2a6   : > { %v1151_v3 = vpack.c.bf16 %v1144_v2, %v1144_v2 }
 0x2a8   : > { %v1203_v5 = vunpack.c.l.b16 %v1151_v3 }
 0x2aa   : > { %v3697_v6 = vpack.c.b16 %v1203_v5, %v1203_v5 }
 0x2ac   : > { %1205 = vrot.lane.b32.xlu0 %v3697_v6, %s3935_s3  ;;  %1156 = vrot.lane.b32.xlu2 %v3699_v7, %s3935_s3  ;;  %s3976_s3 = sld [smem:[#allocation54_spill]] }
 0x2fe   : > { %v1182_v9 = vpop.permute.xlu2 %1181  ;;  %v1230_v10 = vpop.permute.xlu1 %1229 }
 0x2ff   : > { %v1187_v11 = vsel %vm1158_vm9, %v1182_v9, 0  ;;  %v1235_v12 = vsel %vm1158_vm9, %v1230_v10, 0 }
 0x300   : > { %1196 = vmatpush.bf16.xpose.msra.mxu2 %v1187_v11  ;;  %1244 = vmatpush.bf16.xpose.msrb.mxu0 %v1235_v12 }
 0x306   : > { %v1157_v13 = vpop.permute.xlu2 %1156 }
 0x307   : > { %2343 = vmatmul.msk.bf16.vlgmr.msra.gmra.mxu2 %vm1158_vm9, %v1150_v61  ;;  %2345 = vmatmul.msk.bf16.vlgmr.msrb.gmra.mxu0 %vm1158_vm9, %v1152_v57  ;;  %v1163_v14 = vsel %vm1158_vm9, %v1157_v13, 0 }
 0x308   : > { %1172 = vmatpush.bf16.xpose.msra.mxu1 %v1163_v14 }
 0x30f   : > { %2342 = vmatmul.msk.bf16.vlgmr.msra.gmra.mxu1 %vm1158_vm9, %v1149_v1 }
 0x31e   : > { %v1206_v15 = vpop.permute.xlu0 %1205 }
 0x31f   : > { %v1211_v16 = vsel %vm1158_vm9, %v1206_v15, 0 }
 0x320   : > { %1220 = vmatpush.bf16.xpose.msra.mxu3 %v1211_v16 }
 0x327   : > { %2344 = vmatmul.msk.bf16.vlgmr.msra.gmra.mxu3 %vm1158_vm9, %v1151_v3 }
 0x384   : > { %v1246_v18 = vpop.f32.mrf.mxu0 }
 0x385   : > { %v1253_v19 = vmul.f32 0.35355338, %v1246_v18 }
 0x387   : > { %v1260_v20 = vsel %vm1254_vm10, -1e+09, %v1253_v19 }
 0x388   : > { %v1270_v21 = vsel %vm1158_vm9, %v1260_v20, -inf }
 0x389   : > { %1271 = vmax.xlane.f32.xlu0 %v1270_v21 }
 0x38a   : > { %v1198_v23 = vpop.f32.mrf.mxu2 }
 0x38b   : > { %v1251_v24 = vmul.f32 0.35355338, %v1198_v23 }
 0x38c   : > { %v1174_v25 = vpop.f32.mrf.mxu1  ;;  %v1248_v26 = vpop.f32.mrf.mxu0 }
 0x38d   : > { %v1258_v27 = vsel %vm1254_vm10, -1e+09, %v1251_v24  ;;  %v1250_v35 = vmul.f32 0.35355338, %v1174_v25 }
 0x38e   : > { %v1264_v28 = vsel %vm1158_vm9, %v1258_v27, -inf }
 0x38f   : > { %1265 = vmax.xlane.f32.xlu1 %v1264_v28  ;;  %v1257_v37 = vsel %vm1254_vm10, -1e+09, %v1250_v35 }
 0x390   : > { %v1261_v38 = vsel %vm1158_vm9, %v1257_v37, -inf }
 0x392   : > { %v1200_v29 = vpop.f32.mrf.mxu2 }
 0x394   : > { %v1176_v30 = vpop.f32.mrf.mxu1 }
 0x395   : > { %v2427_v30 = vld [vmem:[#allocation11 + $0x8] sm:$0xff] }
 0x39d   : > { %1331 = vrot.lane.b32.xlu0 %v1180_v63, %s3313_s25 }
 0x3aa   : > { %v1222_v31 = vpop.f32.mrf.mxu3 }
 0x3ab   : > { %v1252_v32 = vmul.f32 0.35355338, %v1222_v31  ;;  %v2426_v31 = vld [vmem:[#allocation11] sm:$0xff] }
 0x3ad   : > { %v1259_v33 = vsel %vm1254_vm10, -1e+09, %v1252_v32 }
 0x3ae   : > { %v1267_v34 = vsel %vm1158_vm9, %v1259_v33, -inf }
 0x3af   : > { %1268 = vmax.xlane.f32.xlu2 %v1267_v34 }
 0x3b2   : > { %v1224_v36 = vpop.f32.mrf.mxu3 }
 0x3b7   : > { %1262 = vmax.xlane.f32.xlu2 %v1261_v38 }
 0x3fc   : > { %v1272_v39 = vpop.xlane.xlu0 %1271 }
 0x3fd   : > { %v1276_v40 = vsub.f32 %v1260_v20, %v1272_v39  ;;  %v2652_v39 = vld [vmem:[#allocation13] ss:$0 sm:$0xff] }
 0x3ff   : > { %v1283_v41 = vmul.f32 1.442695, %v1276_v40 }
 0x401   : > { %2670 = vpow2.f32 %v1283_v41 }
 0x402   : > { %v1266_v42 = vpop.xlane.xlu1 %1265 }
 0x403   : > { %v1274_v43 = vsub.f32 %v1258_v27, %v1266_v42 }
 0x405   : > { %v1279_v44 = vmul.f32 1.442695, %v1274_v43 }
 0x407   : > { %v2671_v45 = vpop.eup %2670  ;;  %2672 = vpow2.f32 %v1279_v44 }
 0x408   : > { %v1294_v46 = vsel %vm1158_vm9, %v2671_v45, 0.0 }
 0x409   : > { %1295 = vadd.xlane.f32.xlu1 %v1294_v46 }
 0x40d   : > { %v2673_v47 = vpop.eup %2672 }
 0x40e   : > { %v1288_v50 = vsel %vm1158_vm9, %v2673_v47, 0.0 }
 0x40f   : > { %v1332_v48 = vpop.permute.xlu0 %1331 }
 0x410   : > { %v1337_v49 = vsel %vm1314_vm11, %v1332_v48, 0 }
 0x411   : > { %1346 = vmatpush.bf16.msrb.mxu2 %v1337_v49  ;;  %1289 = vadd.xlane.f32.xlu1 %v1288_v50 }
 0x422   : > { %v1269_v51 = vpop.xlane.xlu2 %1268 }
 0x423   : > { %v1275_v52 = vsub.f32 %v1259_v33, %v1269_v51  ;;  %v2430_v51 = vld [vmem:[#allocation17] sm:$0xff] }
 0x425   : > { %v1281_v53 = vmul.f32 1.442695, %v1275_v52 }
 0x427   : > { %2674 = vpow2.f32 %v1281_v53 }
 0x42a   : > { %1373 = vrot.lane.b32.xlu1 %v3692_v59, %s3313_s25  ;;  %v1263_v54 = vpop.xlane.xlu2 %1262 }
 0x42b   : > { %v1273_v55 = vsub.f32 %v1257_v37, %v1263_v54 }
 0x42d   : > { %v2675_v56 = vpop.eup %2674  ;;  %v1277_v57 = vmul.f32 1.442695, %v1273_v55 }
 0x42e   : > { %v1291_v58 = vsel %vm1158_vm9, %v2675_v56, 0.0 }
 0x42f   : > { %2676 = vpow2.f32 %v1277_v57  ;;  %1292 = vadd.xlane.f32.xlu2 %v1291_v58 }
 0x435   : > { %v2677_v60 = vpop.eup %2676 }
 0x436   : > { %v1285_v61 = vsel %vm1158_vm9, %v2677_v60, 0.0 }
 0x437   : > { %1286 = vadd.xlane.f32.xlu0 %v1285_v61 }
 0x447   : > { %1352 = vrot.lane.b32.xlu2 %v3697_v6, %s3313_s25 }
 0x44f   : > { %1309 = vrot.lane.b32.xlu2 %v3699_v7, %s3313_s25  ;;  %s1029_s25 = scalar_lea.vmem %s3974_s2, %s3670_s30  ;;  %s3985_s30 = sshll.u32 %s3624_s15, 3 }
 0x450   : > { %v1036_v50 = vld [vmem:[%s1029_s25] sm:$0xff]  ;;  %s3982_s25 = sld [smem:[#allocation55_spill]] }
 0x451   : > { %v1037_v52 = vpack.c.bf16 %v1036_v50, %v1036_v50 }
 0x47c   : > { %v1296_v62 = vpop.xlane.xlu1 %1295 }
 0x484   : > { %v1290_v59 = vpop.xlane.xlu1 %1289 }
 0x485   : > { %2678 = vrcp.f32 %v1290_v59 }
 0x486   : > { %2680 = vrcp.f32 %v1296_v62 }
 0x48b   : > { %v2679_v63 = vpop.eup %2678 }
 0x48c   : > { %v1302_v1 = vmul.f32 %v2679_v63, %v2673_v47  ;;  %v2681_v3 = vpop.eup %2680 }
 0x48d   : > { %v1304_v4 = vmul.f32 %v2681_v3, %v2671_v45 }
 0x48e   : > { %v1306_v2 = vpack.c.bf16 %v1302_v1, %v1302_v1 }
 0x48f   : > { %v1308_v10 = vpack.c.bf16 %v1304_v4, %v1304_v4 }
 0x490   : > { %2347 = vmatmul.msk.bf16.vlgmr.msrb.gmra.mxu2 %vm1158_vm9, %v1306_v2 }
 0x49c   : > { %v1374_v5 = vpop.permute.xlu1 %1373 }
 0x49d   : > { %v1379_v9 = vsel %vm1314_vm11, %v1374_v5, 0 }
 0x49e   : > { %1388 = vmatpush.bf16.msra.mxu0 %v1379_v9 }
 0x4a1   : > { %2349 = vmatmul.msk.bf16.vlgmr.msra.gmra.mxu0 %vm1158_vm9, %v1308_v10 }
 0x4a2   : > { %v1293_v6 = vpop.xlane.xlu2 %1292 }
 0x4a3   : > { %2682 = vrcp.f32 %v1293_v6 }
 0x4a9   : > { %v2683_v7 = vpop.eup %2682 }
 0x4aa   : > { %v1303_v11 = vmul.f32 %v2683_v7, %v2675_v56  ;;  %v1287_v12 = vpop.xlane.xlu0 %1286  ;;  %v1353_v13 = vpop.permute.xlu2 %1352  ;;  %v2653_v7 = vld [vmem:[#allocation14] ss:$0 sm:$0xff] }
 0x4ab   : > { %2684 = vrcp.f32 %v1287_v12  ;;  %v1358_v14 = vsel %vm1314_vm11, %v1353_v13, 0 }
 0x4ac   : > { %1367 = vmatpush.bf16.msrb.mxu3 %v1358_v14  ;;  %v1307_v15 = vpack.c.bf16 %v1303_v11, %v1303_v11 }
 0x4af   : > { %2348 = vmatmul.msk.bf16.vlgmr.msrb.gmra.mxu3 %vm1158_vm9, %v1307_v15 }
 0x4b1   : > { %v2685_v16 = vpop.eup %2684 }
 0x4b2   : > { %v1301_v17 = vmul.f32 %v2685_v16, %v2677_v60  ;;  %v1310_v18 = vpop.permute.xlu2 %1309 }
 0x4b3   : > { %v1316_v19 = vsel %vm1314_vm11, %v1310_v18, 0 }
 0x4b4   : > { %1325 = vmatpush.bf16.msrb.mxu1 %v1316_v19  ;;  %v1305_v20 = vpack.c.bf16 %v1301_v17, %v1301_v17  ;;  %v2654_v17 = vld [vmem:[#allocation16] ss:$0 sm:$0xff] }
 0x4b7   : > { %2346 = vmatmul.msk.bf16.vlgmr.msrb.gmra.mxu1 %vm1158_vm9, %v1305_v20 }
 0x4b8   : > { %1437 = vmatpush.bf16.msra.mxu1 %v2427_v30 }
 0x4bc   : > { %1438 = vmatpush.bf16.msra.mxu1 %v2426_v31 }
 0x513   : > { %v1348_v21 = vpop.f32.mrf.mxu2 }
 0x514   : > { %1395 = vrot.lane.b32.xlu1 %v1348_v21, %s3933_s14  ;;  %s3975_s14 = sld [smem:[#allocation51_spill]] }
 0x51a   : > { %v2429_v53 = vld [vmem:[%s3975_s14 + $0x8] sm:$0xff]  ;;  %v2428_v54 = vld [vmem:[%s3975_s14] sm:$0xff] }
 0x51b   : > { %v1350_v23 = vpop.f32.mrf.mxu2  ;;  %1528 = vmatpush.bf16.msra.mxu2 %v2429_v53 }
 0x51c   : > { %v2655_v23 = vld [vmem:[%s3976_s3] ss:$0 sm:$0xff]  ;;  %s3983_s3 = sld [smem:[#allocation56_spill]] }
 0x51e   : > { %v1390_v24 = vpop.f32.mrf.mxu0 }
 0x51f   : > { %1403 = vrot.lane.b32.xlu1 %v1390_v24, %s3932_s13  ;;  %1529 = vmatpush.bf16.msra.mxu2 %v2428_v54  ;;  %s1021_s13 = scalar_lea.vmem [#allocation28], %s3985_s30 }
 0x526   : > { %v1392_v25 = vpop.f32.mrf.mxu0 }
 0x532   : > { %v1369_v26 = vpop.f32.mrf.mxu3 }
 0x533   : > { %1399 = vrot.lane.b32.xlu2 %v1369_v26, %s3934_s17  ;;  %s2040_s17 = sshll.u32 %s1021_s13, 4  ;;  %s2041_s17 = int_to_ptr.vmem [resolvable:$true] %s2040_s17 }
 0x534   : > { %v1327_v27 = vpop.f32.mrf.mxu1 }
 0x53a   : > { %v1371_v28 = vpop.f32.mrf.mxu3 }
 0x53c   : > { %v1329_v29 = vpop.f32.mrf.mxu1 }
 0x53d   : > { %v2656_v29 = vld [vmem:[%s3977_s4] ss:$0 sm:$0xff] }
 0x586   : > { %v1396_v32 = vpop.permute.xlu1 %1395 }
 0x587   : > { %v1406_v34 = vsel %vm1158_vm9, %v1327_v27, %v1396_v32 }
 0x58d   : > { %v1400_v33 = vpop.permute.xlu2 %1399 }
 0x58e   : > { %v1408_v35 = vsel %vm1407_vm12, %v1406_v34, %v1400_v33 }
 0x591   : > { %v1404_v36 = vpop.permute.xlu1 %1403 }
 0x592   : > { %v1410_v37 = vsel %vm1409_vm13, %v1408_v35, %v1404_v36 }
 0x593   : > { %v1411_v38 = vpack.c.bf16 %v1410_v37, %v1410_v37 }
 0x595   : > { %2358 = vmatmul.msk.bf16.vlgmr.msra.gmra.mxu1 %vm1040_vm0, %v1411_v38 }
 0x612   : > { %v1440_v40 = vpop.f32.mrf.mxu1 }
 0x613   : > { %v1444_v41 = vadd.f32 %v1440_v40, %v3676_v0  ;;  %v2431_v0 = vld [vmem:[#allocation17 + $0x8] sm:$0xff] }
 0x614   : > { %1564 = vmatpush.bf16.msra.mxu3 %v2431_v0 }
 0x615   : > { %v3752_v42 = vadd.f32 %v2652_v39, %v1444_v41 }
 0x617   : > { %v1452_v43 = vsel %vm1040_vm0, %v3752_v42, 0.0 }
 0x618   : > { %1453 = vadd.xlane.f32.xlu2 %v1452_v43  ;;  %1565 = vmatpush.bf16.msra.mxu3 %v2430_v51  ;;  %v1571_v51 = vld [vmem:[%s3630_s9] sm:$0xff]  ;;  %s3978_s9 = smov 96  }
 0x619   : > { %vm1680_vm5 = vcmp.eq.s32.totalorder %v1571_v51, 0 }
 0x61a   : > { %v1442_v44 = vpop.f32.mrf.mxu1 }
 0x61b   : > { %2376 = vmatmul.msk.bf16.vlgmr.msra.gmra.mxu3 %vm1040_vm0, %v1037_v52 }
 0x68b   : > { %v1454_v45 = vpop.xlane.xlu2 %1453 }
 0x68c   : > { %v1455_v46 = vmul.f32 %v1454_v45, %v3680_v8 }
 0x68e   : > { %v1456_v47 = vsub.f32 %v3752_v42, %v1455_v46 }
 0x690   : > { %v1457_v48 = vmul.f32 %v1456_v47, %v1456_v47  ;;  %v1477_v15 = vmul.f32 %v2653_v7, %v1456_v47 }
 0x692   : > { %v1458_v49 = vsel %vm1040_vm0, %v1457_v48, 0.0 }
 0x693   : > { %1459 = vadd.xlane.f32.xlu1 %v1458_v49 }
 0x69e   : > { %v1567_v24 = vpop.f32.mrf.mxu3 }
 0x69f   : > { %v1568_v25 = vadd.f32 %v2655_v23, %v1567_v24 }
 0x6a1   : > { %1590 = vrot.lane.b32.xlu0 %v1568_v25, %s3311_s12  ;;  %v3776_v26 = vpack.c.bf16 %v1568_v25, %v1568_v25 }
 0x6a3   : > { %v1604_v27 = vsel %vm1158_vm9, %v3776_v26, 0 }
 0x6a4   : > { %1613 = vmatpush.bf16.xpose.msrb.mxu0 %v1604_v27 }
 0x6a6   : > { %v1569_v28 = vpop.f32.mrf.mxu3 }
 0x6a9   : > { %1593 = vrot.lane.b32.xlu0 %v1568_v25, %s3309_s10 }
 0x6b1   : > { %1587 = vrot.lane.b32.xlu0 %v1568_v25, %s3310_s22 }
 0x706   : > { %v1460_v55 = vpop.xlane.xlu1 %1459 }
 0x707   : > { %v1461_v56 = vmul.f32 %v1460_v55, %v3685_v22 }
 0x709   : > { %2686 = vrsqrt.f32 %v1461_v56  ;;  %vm1469_vm14 = vcmp.eq.f32.partialorder %v1461_v56, inf  ;;  %v1472_v1 = vand.u32 2147483648, %v1461_v56  ;;  %vm1471_vm15 = vcmp.eq.f32.partialorder %v1461_v56, 0.0 }
 0x70f   : > { %v2687_v57 = vpop.eup %2686 }
 0x710   : > { %v1463_v58 = vmul.f32 %v2687_v57, %v1461_v56 }
 0x712   : > { %v1464_v60 = vmul.f32 %v2687_v57, %v1463_v58 }
 0x713   : > { %v1591_v34 = vpop.permute.xlu0 %1590 }
 0x714   : > { %v1465_v61 = vmul.f32 0.5, %v1464_v60  ;;  %v3789_v35 = vpack.c.bf16 %v1591_v34, %v1591_v34 }
 0x716   : > { %v1466_v62 = vsub.f32 1.5, %v1465_v61  ;;  %v1642_v36 = vsel %vm1158_vm9, %v3789_v35, 0 }
 0x717   : > { %1651 = vmatpush.bf16.xpose.msrb.mxu2 %v1642_v36 }
 0x718   : > { %v1467_v59 = vmul.f32 %v2687_v57, %v1466_v62 }
 0x71a   : > { %v1468_v63 = vmul.f32 %v1467_v59, %v1461_v56 }
 0x71b   : > { %v1594_v37 = vpop.permute.xlu0 %1593 }
 0x71c   : > { %v1470_v2 = vsel %vm1469_vm14, %v1461_v56, %v1468_v63  ;;  %v3793_v38 = vpack.c.bf16 %v1594_v37, %v1594_v37 }
 0x71d   : > { %v1473_v3 = vsel %vm1471_vm15, %v1472_v1, %v1470_v2 }
 0x71e   : > { %v1478_v4 = vadd.f32 1e-06, %v1473_v3  ;;  %v1661_v39 = vsel %vm1158_vm9, %v3793_v38, 0 }
 0x71f   : > { %1670 = vmatpush.bf16.xpose.msrb.mxu3 %v1661_v39 }
 0x720   : > { %2688 = vrcp.f32 %v1478_v4  ;;  %v1490_v6 = vand.u32 2147483648, %v1478_v4  ;;  %v1488_v12 = vand.u32 2147483647, %v1478_v4  ;;  %vm1484_vm2 = vweird.f32 %v1478_v4 }
 0x722   : > { %v1491_v14 = vor.u32 1.1754944e-38, %v1490_v6  ;;  %vm1489_vm4 = vcmp.eq.f32.partialorder %v1488_v12, 8.507059e+37 }
 0x723   : > { %v1588_v40 = vpop.permute.xlu0 %1587 }
 0x724   : > { %v3797_v41 = vpack.c.bf16 %v1588_v40, %v1588_v40 }
 0x726   : > { %v2689_v5 = vpop.eup %2688  ;;  %v1623_v43 = vsel %vm1158_vm9, %v3797_v41, 0  ;;  %v1760_v27 = vunpack.c.l.b16 %v3797_v41 }
 0x727   : > { %v1480_v9 = vmul.f32 %v2689_v5, %v1478_v4  ;;  %vm1485_vm1 = vweird.f32 %v2689_v5  ;;  %1632 = vmatpush.bf16.xpose.msrb.mxu1 %v1623_v43 }
 0x728   : > { %vm1486_vm3 = vmor %vm1484_vm2, %vm1485_vm1  ;;  %v1761_v28 = vpack.c.b16 %v1760_v27, %v1760_v27 }
 0x729   : > { %v1481_v10 = vsub.f32 1.0, %v1480_v9 }
 0x72b   : > { %v1482_v11 = vmul.f32 %v2689_v5, %v1481_v10 }
 0x72d   : > { %v1483_v13 = vadd.f32 %v2689_v5, %v1482_v11 }
 0x72f   : > { %v1487_v16 = vsel %vm1486_vm3, %v2689_v5, %v1483_v13 }
 0x730   : > { %v1492_v18 = vsel %vm1489_vm4, %v1491_v14, %v1487_v16 }
 0x731   : > { %v1493_v19 = vmul.f32 %v1492_v18, %v1477_v15 }
 0x733   : > { %v1497_v20 = vadd.f32 %v2654_v17, %v1493_v19 }
 0x735   : > { %v1498_v21 = vpack.c.bf16 %v1497_v20, %v1497_v20 }
 0x737   : > { %2367 = vmatmul.msk.bf16.vlgmr.msra.gmra.mxu2 %vm1040_vm0, %v1498_v21  ;;  %v1784_v21 = vunpack.c.l.b16 %v3789_v35 }
 0x739   : > { %v1785_v24 = vpack.c.b16 %v1784_v21, %v1784_v21 }
 0x7ba   : > { %v1531_v30 = vpop.f32.mrf.mxu2 }
 0x7bb   : > { %v1532_v31 = vadd.f32 %v2656_v29, %v1531_v30  ;;  %v1736_v29 = vunpack.c.l.b16 %v3776_v26  ;;  %v1808_v30 = vunpack.c.l.b16 %v3793_v38 }
 0x7bd   : > { %v1582_v32 = vpack.c.bf16 %v1532_v31, %v1532_v31  ;;  %1573 = vrot.lane.b32.xlu0 %v1532_v31, %s3310_s22  ;;  %1579 = vrot.lane.b32.xlu1 %v1532_v31, %s3309_s10  ;;  %s3979_s10 = smov 16   ;;  %s3980_s22 = smov 8  }
 0x7be   : > { %1576 = vrot.lane.b32.xlu2 %v1532_v31, %s3311_s12  ;;  %v1737_v31 = vpack.c.b16 %v1736_v29, %v1736_v29  ;;  %s3981_s12 = smov 24   ;;  %v2435_v29 = vld [vmem:[#allocation23 + $0x8] sm:$0xff] }
 0x7bf   : > { %2377 = vmatmul.msk.bf16.vlgmr.msrb.gmra.mxu0 %vm1158_vm9, %v1582_v32 }
 0x7c2   : > { %v1533_v33 = vpop.f32.mrf.mxu2 }
 0x7c3   : > { %v1809_v33 = vpack.c.b16 %v1808_v30, %v1808_v30  ;;  %v2434_v30 = vld [vmem:[#allocation23] sm:$0xff] }
 0x818   : > { %v1577_v44 = vpop.permute.xlu2 %1576 }
 0x819   : > { %v1584_v45 = vpack.c.bf16 %v1577_v44, %v1577_v44 }
 0x81b   : > { %2379 = vmatmul.msk.bf16.vlgmr.msrb.gmra.mxu2 %vm1158_vm9, %v1584_v45 }
 0x82f   : > { %v1574_v46 = vpop.permute.xlu0 %1573  ;;  %v1580_v47 = vpop.permute.xlu1 %1579 }
 0x830   : > { %v1583_v48 = vpack.c.bf16 %v1574_v46, %v1574_v46  ;;  %v1585_v49 = vpack.c.bf16 %v1580_v47, %v1580_v47 }
 0x832   : > { %2378 = vmatmul.msk.bf16.vlgmr.msrb.gmra.mxu1 %vm1158_vm9, %v1583_v48  ;;  %2380 = vmatmul.msk.bf16.vlgmr.msrb.gmra.mxu3 %vm1158_vm9, %v1585_v49 }
 0x83c   : > { %v1615_v0 = vpop.f32.mrf.mxu0 }
 0x83d   : > { %v1676_v56 = vmul.f32 0.35355338, %v1615_v0 }
 0x83f   : > { %v1683_v58 = vsel %vm1680_vm5, -1e+09, %v1676_v56 }
 0x840   : > { %v1687_v60 = vsel %vm1158_vm9, %v1683_v58, -inf }
 0x844   : > { %v1617_v50 = vpop.f32.mrf.mxu0 }
 0x89e   : > { %v1653_v52 = vpop.f32.mrf.mxu2 }
 0x89f   : > { %v1678_v53 = vmul.f32 0.35355338, %v1653_v52 }
 0x8a1   : > { %v1685_v54 = vsel %vm1680_vm5, -1e+09, %v1678_v53 }
 0x8a2   : > { %v1693_v55 = vsel %vm1158_vm9, %v1685_v54, -inf }
 0x8a3   : > { %1694 = vmax.xlane.f32.xlu0 %v1693_v55 }
 0x8a6   : > { %v1655_v57 = vpop.f32.mrf.mxu2 }
 0x8ab   : > { %1688 = vmax.xlane.f32.xlu0 %v1687_v60 }
 0x8af   : > { %v1634_v61 = vpop.f32.mrf.mxu1 }
 0x8b0   : > { %v1677_v62 = vmul.f32 0.35355338, %v1634_v61 }
 0x8b2   : > { %v1684_v59 = vsel %vm1680_vm5, -1e+09, %v1677_v62 }
 0x8b3   : > { %v1690_v63 = vsel %vm1158_vm9, %v1684_v59, -inf }
 0x8b4   : > { %1691 = vmax.xlane.f32.xlu1 %v1690_v63 }
 0x8b5   : > { %v1672_v1 = vpop.f32.mrf.mxu3 }
 0x8b6   : > { %v1679_v2 = vmul.f32 0.35355338, %v1672_v1 }
 0x8b7   : > { %v1636_v3 = vpop.f32.mrf.mxu1 }
 0x8b8   : > { %v1686_v4 = vsel %vm1680_vm5, -1e+09, %v1679_v2 }
 0x8b9   : > { %v1696_v5 = vsel %vm1158_vm9, %v1686_v4, -inf }
 0x8ba   : > { %1697 = vmax.xlane.f32.xlu2 %v1696_v5 }
 0x8bd   : > { %v1674_v9 = vpop.f32.mrf.mxu3 }
 0x8be   : > { %v2433_v9 = vld [vmem:[#allocation19 + $0x8] sm:$0xff] }
 0x916   : > { %v1695_v10 = vpop.xlane.xlu0 %1694 }
 0x917   : > { %v1701_v6 = vsub.f32 %v1685_v54, %v1695_v10  ;;  %v2432_v10 = vld [vmem:[#allocation19] sm:$0xff] }
 0x919   : > { %v1707_v7 = vmul.f32 1.442695, %v1701_v6 }
 0x91b   : > { %2690 = vpow2.f32 %v1707_v7 }
 0x91e   : > { %v1689_v32 = vpop.xlane.xlu0 %1688 }
 0x91f   : > { %v1699_v34 = vsub.f32 %v1683_v58, %v1689_v32 }
 0x921   : > { %v2691_v11 = vpop.eup %2690  ;;  %v1703_v35 = vmul.f32 1.442695, %v1699_v34 }
 0x922   : > { %v1717_v12 = vsel %vm1158_vm9, %v2691_v11, 0.0 }
 0x923   : > { %1718 = vadd.xlane.f32.xlu2 %v1717_v12 }
 0x927   : > { %v1692_v13 = vpop.xlane.xlu1 %1691 }
 0x928   : > { %v1700_v14 = vsub.f32 %v1684_v59, %v1692_v13 }
 0x92a   : > { %v1705_v15 = vmul.f32 1.442695, %v1700_v14 }
 0x92c   : > { %2692 = vpow2.f32 %v1705_v15 }
 0x92d   : > { %v1698_v16 = vpop.xlane.xlu2 %1697 }
 0x92e   : > { %v1702_v17 = vsub.f32 %v1686_v4, %v1698_v16  ;;  %v2657_v16 = vld [vmem:[%s3982_s25] ss:$0 sm:$0xff]  ;;  %s3984_s25 = sld [smem:[#allocation57_spill]] }
 0x930   : > { %v1709_v18 = vmul.f32 1.442695, %v1702_v17 }
 0x932   : > { %v2693_v19 = vpop.eup %2692  ;;  %2694 = vpow2.f32 %v1709_v18 }
 0x933   : > { %v1714_v20 = vsel %vm1158_vm9, %v2693_v19, 0.0  ;;  %2696 = vpow2.f32 %v1703_v35 }
 0x934   : > { %1715 = vadd.xlane.f32.xlu0 %v1714_v20  ;;  %s3210_s11 = scalar_lea.hbm %s3984_s25, 16 }
 0x938   : > { %v2695_v23 = vpop.eup %2694 }
 0x939   : > { %v1720_v25 = vsel %vm1158_vm9, %v2695_v23, 0.0  ;;  %v2697_v36 = vpop.eup %2696 }
 0x93a   : > { %1721 = vadd.xlane.f32.xlu1 %v1720_v25  ;;  %v1711_v37 = vsel %vm1158_vm9, %v2697_v36, 0.0 }
 0x93b   : > { %1786 = vrot.lane.b32.xlu2 %v1785_v24, %s3978_s9 }
 0x948   : > { %1762 = vrot.lane.b32.xlu0 %v1761_v28, %s3978_s9 }
 0x950   : > { %1738 = vrot.lane.b32.xlu0 %v1737_v31, %s3978_s9 }
 0x953   : > { %1810 = vrot.lane.b32.xlu1 %v1809_v33, %s3978_s9  ;;  %s2028_s9 = scalar_lea.sflag [#allocation4], %s3624_s15 }
 0x964   : > { %1712 = vadd.xlane.f32.xlu2 %v1711_v37 }
 0x996   : > { %v1719_v39 = vpop.xlane.xlu2 %1718 }
 0x997   : > { %2698 = vrcp.f32 %v1719_v39  ;;  %v2438_v39 = vld [vmem:[%s3983_s3 + $0x10] sm:$0xff] }
 0x99d   : > { %v2699_v40 = vpop.eup %2698 }
 0x99e   : > { %v1729_v26 = vmul.f32 %v2699_v40, %v2691_v11  ;;  %v1787_v41 = vpop.permute.xlu2 %1786 }
 0x99f   : > { %v1792_v38 = vsel %vm1314_vm11, %v1787_v41, 0 }
 0x9a0   : > { %v1733_v43 = vpack.c.bf16 %v1729_v26, %v1729_v26  ;;  %1801 = vmatpush.bf16.msra.mxu2 %v1792_v38 }
 0x9a3   : > { %2383 = vmatmul.msk.bf16.vlgmr.msra.gmra.mxu2 %vm1158_vm9, %v1733_v43 }
 0x9a7   : > { %v1716_v44 = vpop.xlane.xlu0 %1715 }
 0x9a8   : > { %2700 = vrcp.f32 %v1716_v44 }
 0x9ad   : > { %v1722_v46 = vpop.xlane.xlu1 %1721 }
 0x9ae   : > { %v2701_v45 = vpop.eup %2700  ;;  %2702 = vrcp.f32 %v1722_v46 }
 0x9af   : > { %v1728_v47 = vmul.f32 %v2701_v45, %v2693_v19 }
 0x9b1   : > { %v1732_v0 = vpack.c.bf16 %v1728_v47, %v1728_v47  ;;  %v2658_v47 = vld [vmem:[#allocation20] ss:$0 sm:$0xff] }
 0x9b4   : > { %v2703_v50 = vpop.eup %2702 }
 0x9b5   : > { %v1730_v53 = vmul.f32 %v2703_v50, %v2695_v23 }
 0x9b7   : > { %v1734_v56 = vpack.c.bf16 %v1730_v53, %v1730_v53  ;;  %v2659_v53 = vld [vmem:[#allocation22] ss:$0 sm:$0xff] }
 0x9ba   : > { %v1763_v48 = vpop.permute.xlu0 %1762 }
 0x9bb   : > { %v1768_v49 = vsel %vm1314_vm11, %v1763_v48, 0 }
 0x9bc   : > { %1777 = vmatpush.bf16.msra.mxu1 %v1768_v49 }
 0x9bf   : > { %2382 = vmatmul.msk.bf16.vlgmr.msra.gmra.mxu1 %vm1158_vm9, %v1732_v0 }
 0x9c0   : > { %1963 = vmatpush.bf16.msrb.mxu1 %v2435_v29 }
 0x9c2   : > { %v1739_v51 = vpop.permute.xlu0 %1738 }
 0x9c3   : > { %v1744_v52 = vsel %vm1314_vm11, %v1739_v51, 0 }
 0x9c4   : > { %1753 = vmatpush.bf16.msra.mxu0 %v1744_v52  ;;  %1964 = vmatpush.bf16.msrb.mxu1 %v2434_v30 }
 0x9c5   : > { %v1811_v54 = vpop.permute.xlu1 %1810 }
 0x9c6   : > { %v1816_v55 = vsel %vm1314_vm11, %v1811_v54, 0 }
 0x9c7   : > { %1825 = vmatpush.bf16.msra.mxu3 %v1816_v55 }
 0x9c8   : > { %1872 = vmatpush.bf16.msrb.mxu0 %v2433_v9 }
 0x9ca   : > { %2384 = vmatmul.msk.bf16.vlgmr.msra.gmra.mxu3 %vm1158_vm9, %v1734_v56 }
 0x9cc   : > { %1873 = vmatpush.bf16.msrb.mxu0 %v2432_v10 }
 0x9d7   : > { %v1713_v57 = vpop.xlane.xlu2 %1712 }
 0x9d8   : > { %2704 = vrcp.f32 %v1713_v57 }
 0x9de   : > { %v2705_v58 = vpop.eup %2704 }
 0x9df   : > { %v1727_v60 = vmul.f32 %v2705_v58, %v2697_v36  ;;  %v2437_v58 = vld [vmem:[%s3983_s3 + $0x8] sm:$0xff] }
 0x9e1   : > { %v1731_v61 = vpack.c.bf16 %v1727_v60, %v1727_v60  ;;  %v2436_v60 = vld [vmem:[%s3983_s3] sm:$0xff] }
 0x9e3   : > { %2381 = vmatmul.msk.bf16.vlgmr.msra.gmra.mxu0 %vm1158_vm9, %v1731_v61  ;;  %v2660_v61 = vld [vmem:[#allocation25] ss:$0 sm:$0xff] }
 0xa26   : > { %v1803_v62 = vpop.f32.mrf.mxu2 }
 0xa27   : > { %1836 = vrot.lane.b32.xlu0 %v1803_v62, %s3979_s10 }
 0xa2e   : > { %v1805_v59 = vpop.f32.mrf.mxu2 }
 0xa3c   : > { %v1779_v63 = vpop.f32.mrf.mxu1 }
 0xa3d   : > { %1832 = vrot.lane.b32.xlu1 %v1779_v63, %s3980_s22 }
 0xa44   : > { %v1781_v1 = vpop.f32.mrf.mxu1 }
 0xa4d   : > { %v1827_v2 = vpop.f32.mrf.mxu3 }
 0xa4e   : > { %1840 = vrot.lane.b32.xlu1 %v1827_v2, %s3981_s12  ;;  %s2421_s12 = sshll.u32 %s3466_s7, 3 }
 0xa4f   : > { %s2038_s1 = scalar_lea.hbm %s3984_s25, %s2421_s12 }
 0xa50   : > { %s2042_s4 = sshll.u32 %s2038_s1, 4  ;;  %s2043_s4 = int_to_ptr.hbm [resolvable:$true] %s2042_s4 }
 0xa51   : > { %s3204_s7 = sshra.s32 %s2043_s4, 4  ;;  %s3205_s7 = int_to_ptr.hbm [resolvable:$true] %s3204_s7 }
 0xa52   : > { %s3206_s10 = scalar_lea.hbm %s3205_s7, 8  ;;  %p3211_p8 = scmp.lt.s32.totalorder %s3205_s7, %s3984_s25 }
 0xa53   : > { %p3207_p1 = scmp.ne.s32.totalorder %s3205_s7, %s3206_s10  ;;  %p3212_p7 = scmp.lt.s32.totalorder %s3210_s11, %s3206_s10 }
 0xa55   : > { %v1829_v3 = vpop.f32.mrf.mxu3  ;;  %p3208_p4 = pnand %p3207_p1, %p3593_p13  ;;  %p3213_p9 = por %p3212_p7, %p3211_p8 }
 0xa56   : > { %v2661_v3 = vld [vmem:[#allocation26] ss:$0 sm:$0xff] }
 0xa57   : > { %p3209_p12 = pneg %p3208_p4 }
 0xa59   : > { %p3214_p10 = pnand %p3213_p9, %p3209_p12 }
 0xa60   : > { %v1755_v4 = vpop.f32.mrf.mxu0 }
 0xa68   : > { %v1757_v5 = vpop.f32.mrf.mxu0 }
 0xa99   : > { %v1837_v11 = vpop.permute.xlu0 %1836 }
 0xaaf   : > { %v1833_v6 = vpop.permute.xlu1 %1832 }
 0xab0   : > { %v1843_v7 = vsel %vm1158_vm9, %v1755_v4, %v1833_v6 }
 0xab1   : > { %v1844_v12 = vsel %vm1407_vm12, %v1843_v7, %v1837_v11  ;;  %vm2008_vm12 = vcmask 523264  }
 0xac0   : > { %v1841_v13 = vpop.permute.xlu1 %1840 }
 0xac1   : > { %v1845_v14 = vsel %vm1409_vm13, %v1844_v12, %v1841_v13 }
 0xac2   : > { %v1846_v15 = vpack.c.bf16 %v1845_v14, %v1845_v14 }
 0xac4   : > { %2393 = vmatmul.msk.bf16.vlgmr.msrb.gmra.mxu0 %vm1040_vm0, %v1846_v15 }
 0xb41   : > { %v1875_v17 = vpop.f32.mrf.mxu0 }
 0xb42   : > { %v1879_v18 = vadd.f32 %v1875_v17, %v3752_v42 }
 0xb44   : > { %v3844_v19 = vadd.f32 %v2657_v16, %v1879_v18 }
 0xb46   : > { %v1887_v20 = vsel %vm1040_vm0, %v3844_v19, 0.0 }
 0xb47   : > { %1888 = vadd.xlane.f32.xlu0 %v1887_v20 }
 0xb49   : > { %v1877_v21 = vpop.f32.mrf.mxu0 }
 0xbba   : > { %v1889_v23 = vpop.xlane.xlu0 %1888 }
 0xbbb   : > { %v1890_v24 = vmul.f32 %v1889_v23, %v3680_v8  ;;  %v2439_v8 = vld [vmem:[%s3983_s3 + $0x18] sm:$0xff] }
 0xbbc   : > { %2016 = vmatpush.bf16.msrb.mxu2 %v2439_v8 }
 0xbbd   : > { %v1891_v25 = vsub.f32 %v3844_v19, %v1890_v24 }
 0xbbf   : > { %v1892_v27 = vmul.f32 %v1891_v25, %v1891_v25  ;;  %v1912_v51 = vmul.f32 %v2658_v47, %v1891_v25 }
 0xbc0   : > { %2017 = vmatpush.bf16.msrb.mxu2 %v2438_v39 }
 0xbc1   : > { %v1893_v28 = vsel %vm1040_vm0, %v1892_v27, 0.0 }
 0xbc2   : > { %1894 = vadd.xlane.f32.xlu1 %v1893_v28 }
 0xbc4   : > { %2018 = vmatpush.bf16.msrb.mxu2 %v2437_v58 }
 0xbc8   : > { %2019 = vmatpush.bf16.msrb.mxu2 %v2436_v60 }
 0xc35   : > { %v1895_v42 = vpop.xlane.xlu1 %1894 }
 0xc36   : > { %v1896_v31 = vmul.f32 %v1895_v42, %v3685_v22 }
 0xc38   : > { %2706 = vrsqrt.f32 %v1896_v31  ;;  %vm1904_vm6 = vcmp.eq.f32.partialorder %v1896_v31, inf  ;;  %v1907_v26 = vand.u32 2147483648, %v1896_v31  ;;  %vm1906_vm7 = vcmp.eq.f32.partialorder %v1896_v31, 0.0 }
 0xc3e   : > { %v2707_v32 = vpop.eup %2706 }
 0xc3f   : > { %v1898_v33 = vmul.f32 %v2707_v32, %v1896_v31 }
 0xc41   : > { %v1899_v34 = vmul.f32 %v2707_v32, %v1898_v33 }
 0xc43   : > { %v1900_v35 = vmul.f32 0.5, %v1899_v34 }
 0xc45   : > { %v1901_v36 = vsub.f32 1.5, %v1900_v35 }
 0xc47   : > { %v1902_v37 = vmul.f32 %v2707_v32, %v1901_v36 }
 0xc49   : > { %v1903_v40 = vmul.f32 %v1902_v37, %v1896_v31 }
 0xc4b   : > { %v1905_v22 = vsel %vm1904_vm6, %v1896_v31, %v1903_v40 }
 0xc4c   : > { %v1908_v41 = vsel %vm1906_vm7, %v1907_v26, %v1905_v22 }
 0xc4d   : > { %v1913_v38 = vadd.f32 1e-06, %v1908_v41 }
 0xc4f   : > { %2708 = vrcp.f32 %v1913_v38  ;;  %v1925_v46 = vand.u32 2147483648, %v1913_v38  ;;  %v1923_v49 = vand.u32 2147483647, %v1913_v38  ;;  %vm1919_vm9 = vweird.f32 %v1913_v38 }
 0xc51   : > { %v1926_v50 = vor.u32 1.1754944e-38, %v1925_v46  ;;  %vm1924_vm11 = vcmp.eq.f32.partialorder %v1923_v49, 8.507059e+37 }
 0xc55   : > { %v2709_v43 = vpop.eup %2708 }
 0xc56   : > { %v1915_v44 = vmul.f32 %v2709_v43, %v1913_v38  ;;  %vm1920_vm8 = vweird.f32 %v2709_v43 }
 0xc57   : > { %vm1921_vm10 = vmor %vm1919_vm9, %vm1920_vm8 }
 0xc58   : > { %v1916_v45 = vsub.f32 1.0, %v1915_v44 }
 0xc5a   : > { %v1917_v48 = vmul.f32 %v2709_v43, %v1916_v45 }
 0xc5c   : > { %v1918_v0 = vadd.f32 %v2709_v43, %v1917_v48 }
 0xc5e   : > { %v1922_v52 = vsel %vm1921_vm10, %v2709_v43, %v1918_v0 }
 0xc5f   : > { %v1927_v54 = vsel %vm1924_vm11, %v1926_v50, %v1922_v52 }
 0xc60   : > { %v1928_v55 = vmul.f32 %v1927_v54, %v1912_v51 }
 0xc62   : > { %v1932_v56 = vadd.f32 %v2659_v53, %v1928_v55 }
 0xc64   : > { %v1933_v57 = vpack.c.bf16 %v1932_v56, %v1932_v56 }
 0xc66   : > { %2402 = vmatmul.msk.bf16.vlgmr.msrb.gmra.mxu1 %vm1040_vm0, %v1933_v57 }
 0xce3   : > { %v1966_v62 = vpop.f32.mrf.mxu1 }
 0xce4   : > { %v1967_v59 = vadd.f32 %v2660_v61, %v1966_v62 }
 0xce6   : > { %v1970_v63 = vmax.f32 %v1967_v59, 0.0 }
 0xce8   : > { %v1971_v1 = vpack.c.bf16 %v1970_v63, %v1970_v63 }
 0xcea   : > { %2419 = vmatmul.msk.bf16.vlgmr.msrb.gmra.mxu2 %vm2008_vm12, %v1971_v1 }
 0xceb   : > { %v1968_v2 = vpop.f32.mrf.mxu1 }
 0xd6d   : > { %v2021_v4 = vpop.f32.mrf.mxu2 }
 0xd6e   : > { %v2022_v5 = vadd.f32 %v2661_v3, %v2021_v4 }
 0xd70   : > { %v2025_v9 = vadd.f32 %v2022_v5, %v3844_v19 }
 0xd72   : > { %2026 = vst.msk [vmem:[%s1021_s13] sm:$0xff] %vm1040_vm0, %v2025_v9 }
 0xd73   : > { %3217 = shalt.err (!%p3214_p10)
}
 0xd74   : > { %2502 = dma.vmem_to_hbm [thread:$0]  (%p3593_p13), %s2041_s17, 128, %s2043_s4, %s2028_s9  }
 0xd75   : > { %v2023_v10 = vpop.f32.mrf.mxu2 }
 0xd76 PF: > { %s2054_s15 = sand.u32 1, %s3276_s5   ;;  %p3986_p11 = scmp.ge.s32.totalorder %s3288_s28, 2 }
 0xd77   : > { %s2055_s30 = scalar_lea.sflag [#allocation4], %s2054_s15 }
 0xd78   : > { %p2555_p0 = pnand %p3986_p11, %p3598_p5 }
 0xd7a   : > { %p2556_p2 = pneg %p2555_p0 }
 0xd7c   : > { %3271 = dma.done.wait (%p2556_p2), %s2055_s30, 128  }
 0xd7d   : > { %3273 = vsyncadd (%p2556_p2), %s2055_s30, 4294967168  ;;  %p45_p6 = scmp.ge.s32.totalorder %s3573_s29, 4   ;;  %s3987_s5 = smov %s3280_s26 }
 0xd7e   : > { %s3988_s26 = smov %s3284_s27  ;;  %s3989_s27 = smov %s3585_s8 }
 0xd7f   : > { %s3990_s28 = smov %s3573_s29  ;;  %47 = sbr.rel (!%p45_p6) target bundleno = 33 (0x21), region = 230 }
 0xd84   :  { %2061 = vsyncpa [#allocation3], 1 }
 0xd85   :  { %2063 = vsyncpa [#allocation3 + $0x1], 1 }
 0xd86   :  { %2064 = vsyncpa [#allocation6], 1 }
 0xd87   :  { %2065 = vsyncpa [#allocation9], 1 }
 0xd88   :  { %2066 = vsyncpa [#allocation12], 1 }
 0xd89   :  { %2067 = vsyncpa [#allocation15], 1 }
 0xd8a   :  { %2068 = vsyncpa [#allocation18], 1 }
 0xd8b   :  { %2069 = vsyncpa [#allocation21], 1 }
 0xd8c   :  { %2070 = vsyncpa [#allocation24], 1 }
 0xd8d   :  { %2071 = vsyncpa [#allocation27], 1 }
 0xd8e   :  { %2072 = vsyncpa [#allocation4], 1 }
 0xd8f   :  { %2074 = vsyncpa [#allocation4 + $0x1], 1 }

</bundles_post_ra>
